<compile_context>
chip_gen: v6e
topology: v6e:2x2x1
jax: 0.10.0
libtpu: 0.0.40
codegen_flags: <defaults>
</compile_context>

<pallas_src>
import functools

import jax
import jax.numpy as jnp
from jax.experimental import pallas as pl
from jax.experimental.pallas import tpu as pltpu


def _se_kernel(x_ref, w1_ref, w2_ref, o_ref, gate_ref, *,
               inv_hw, c_chunk, use_vpu_excitation, use_chunked_scale):
    btile, C, HW = x_ref.shape

    # ---- Squeeze: global average pool in f32 with a compile-time 1/HW scale. ----
    # The big tile load feeds straight into the lane reduce; nothing of it is kept
    # live for the scale phase (which re-reads the VMEM ref chunk-by-chunk below).
    pooled = jnp.sum(x_ref[...].astype(jnp.float32), axis=-1) * inv_hw      # (btile, C)

    # ---- Excitation: fc1 -> ReLU -> fc2 -> sigmoid, all in f32. ----
    w1 = w1_ref[...]                                                        # (hid, C)
    w2 = w2_ref[...]                                                        # (C, hid)
    if use_vpu_excitation:
        # hid = C // reduction is tiny: broadcast-mul + lane reduce on the VPU/XLU
        # avoids the heavily padded multi-pass f32 MXU matmul entirely.
        h = jnp.sum(pooled[:, None, :] * w1[None, :, :], axis=-1)           # (btile, hid)
        h = jnp.maximum(h, 0.0)
        y = jnp.sum(h[:, None, :] * w2[None, :, :], axis=-1)                # (btile, C)
    else:
        h = jax.lax.dot_general(pooled, w1, (((1,), (1,)), ((), ())),
                                preferred_element_type=jnp.float32)         # (btile, hid)
        h = jnp.maximum(h, 0.0)
        y = jax.lax.dot_general(h, w2, (((1,), (1,)), ((), ())),
                                preferred_element_type=jnp.float32)         # (btile, C)

    # Park the f32 gate in a tiny VMEM scratch so the scale loop can slice it.
    gate_ref[...] = jax.nn.sigmoid(y)[:, :, None]                           # (btile, C, 1)

    # ---- Scale: per-channel gate broadcast over the spatial lanes. ----
    if use_chunked_scale:
        n_chunks = C // c_chunk

        def body(i, carry):
            c0 = pl.multiple_of(i * c_chunk, c_chunk)
            xv = x_ref[:, pl.ds(c0, c_chunk), :]                            # (btile, cc, HW)
            g = gate_ref[:, pl.ds(c0, c_chunk), :]                          # (btile, cc, 1) f32
            o_ref[:, pl.ds(c0, c_chunk), :] = (xv * g).astype(o_ref.dtype)
            return carry

        jax.lax.fori_loop(0, n_chunks, body, 0, unroll=n_chunks <= 16)
    else:
        # Fallback (C not sublane-aligned): re-read x_ref so the tile is still not
        # kept live across the excitation.
        o_ref[...] = (x_ref[...] * gate_ref[...]).astype(o_ref.dtype)


def _tpu_params():
    """(vmem_capacity_bytes, tensorcores_per_chip) with conservative fallbacks."""
    vmem_bytes = 128 << 20
    try:
        info = pltpu.get_tpu_info()
        vmem_bytes = int(getattr(info, "vmem_capacity_bytes", vmem_bytes) or vmem_bytes)
    except Exception:
        pass
    num_tc = 1
    try:
        num_tc = int(getattr(jax.devices()[0], "num_cores", 1) or 1)
    except Exception:
        pass
    # v7x is the 64 MiB-per-TensorCore generation and has 2 TensorCores per chip.
    if vmem_bytes <= (64 << 20):
        num_tc = max(num_tc, 2)
    return vmem_bytes, num_tc


def se_block(x, w1, w2, *, vmem_budget_bytes=None):
    """SEBlock forward.  x: (B, C, H, W);  w1: (C//r, C) fc1;  w2: (C, C//r) fc2."""
    B, C, H, W = x.shape
    hid = w1.shape[0]
    HW = H * W

    # Lane dim = full HW (no pad, no slice): merging minor dims is layout-only.
    x_flat = x.reshape(B, C, HW)
    w1f = w1.astype(jnp.float32)                                # (hid, C)
    w2f = w2.astype(jnp.float32)                                # (C, hid)

    vmem_bytes, num_tc = _tpu_params()
    hard_cap = int(0.75 * vmem_bytes)                           # ~48 MiB v7x, ~96 MiB v5e/v6e
    if vmem_budget_bytes is None:
        vmem_budget_bytes = (24 << 20) if vmem_bytes <= (64 << 20) else (48 << 20)
    vmem_budget_bytes = min(vmem_budget_bytes, hard_cap)

    itemsize = jnp.dtype(x.dtype).itemsize
    tile_bytes = C * HW * itemsize                              # one batch element (in OR out)
    weight_bytes = 4 * (w1f.size + w2f.size)

    # Guard: even a single-batch, double-buffered in+out tile must fit the chip.
    if 4 * tile_bytes + 2 * weight_bytes + (1 << 20) > hard_cap:
        # TODO(synk): spatial-split two-pass kernel (pooled-sum pass + scale pass).
        raise NotImplementedError(
            "SEBlock tile (C*H*W) too large for VMEM on this chip; needs the "
            "two-pass spatial split")

    # Largest batch tile under the soft budget.  Only on multi-TensorCore chips
    # (v7x) do we force at least one grid step per core; single-TC v5e/v6e may
    # use btile == B (grid == 1) to amortize the ~0.35us/step pipeline overhead.
    btile = 1
    for cand in range(1, B + 1):
        if B % cand:
            continue
        if 4 * cand * tile_bytes + 2 * weight_bytes > vmem_budget_bytes:
            continue
        if num_tc >= 2 and B > 1 and (B // cand) < num_tc:
            continue
        btile = cand
    grid = (B // btile,)

    needed = 4 * btile * tile_bytes + 2 * weight_bytes + btile * C * 128 * 4
    vmem_limit = int(min(hard_cap, max(32 << 20, needed + (4 << 20))))

    # Channel chunk for the scale loop: sublane-aligned (dtype-packing aware),
    # divides C, and keeps one chunk modest so vreg liveness stays bounded.
    sublane = 8 * max(1, 4 // itemsize)                         # f32:8, bf16:16, int8:32
    c_chunk = 0
    if C % sublane == 0:
        c_chunk = sublane
        cand = C
        while cand >= sublane:
            if C % cand == 0 and btile * cand * HW * itemsize <= (64 << 10):
                c_chunk = cand
                break
            cand -= sublane
    use_chunked_scale = c_chunk > 0

    kernel = functools.partial(
        _se_kernel,
        inv_hw=1.0 / HW,
        c_chunk=max(c_chunk, 1),
        use_vpu_excitation=hid <= 16,
        use_chunked_scale=use_chunked_scale,
    )

    out = pl.pallas_call(
        kernel,
        out_shape=jax.ShapeDtypeStruct((B, C, HW), x.dtype),
        grid_spec=pltpu.PrefetchScalarGridSpec(
            num_scalar_prefetch=0,
            grid=grid,
            in_specs=[
                pl.BlockSpec((btile, C, HW), lambda b: (b, 0, 0)),
                pl.BlockSpec((hid, C), lambda b: (0, 0)),
                pl.BlockSpec((C, hid), lambda b: (0, 0)),
            ],
            out_specs=pl.BlockSpec((btile, C, HW), lambda b: (b, 0, 0)),
            scratch_shapes=[pltpu.VMEM((btile, C, 1), jnp.float32)],
        ),
        compiler_params=pltpu.CompilerParams(
            dimension_semantics=("parallel",),
            vmem_limit_bytes=vmem_limit,
        ),
    )(x_flat, w1f, w2f)

    return out.reshape(B, C, H, W)


def se_block_ref(x, w1, w2):
    # Pure-JAX reference mirroring the PyTorch SEBlock forward (f32 math).
    hp = jax.lax.Precision.HIGHEST
    y = jnp.mean(x.astype(jnp.float32), axis=(2, 3))                      # (B, C)
    y = jnp.maximum(jnp.dot(y, w1.T, precision=hp), 0.0)                  # fc1 + ReLU
    y = jax.nn.sigmoid(jnp.dot(y, w2.T, precision=hp))                    # fc2 + Sigmoid
    return (x.astype(jnp.float32) * y[:, :, None, None]).astype(x.dtype)


if __name__ == "__main__":
    # Shapes consistent with MFDM(dim=128): low_dim = 64 -> SEBlock(dim=64, reduction=16).
    # H = W = 16 -> HW = 256 lanes (lane-dense, no masked stores on this demo shape).
    B, C, H, W = 2, 64, 16, 16
    reduction = 16
    hid = C // reduction

    key = jax.random.PRNGKey(0)
    kx, k1, k2 = jax.random.split(key, 3)
    x = jax.random.normal(kx, (B, C, H, W), dtype=jnp.float32)
    w1 = jax.random.normal(k1, (hid, C), dtype=jnp.float32) * 0.1
    w2 = jax.random.normal(k2, (C, hid), dtype=jnp.float32) * 0.1

    out = jax.block_until_ready(se_block(x, w1, w2))
    ref = se_block_ref(x, w1, w2)
    assert out.shape == (B, C, H, W)
    assert jnp.allclose(out, ref, atol=1e-5, rtol=1e-5), float(jnp.max(jnp.abs(out - ref)))

    # bf16 gating tolerance check (gate computed and applied in f32, stored bf16).
    x_bf16 = x.astype(jnp.bfloat16)
    out_bf16 = jax.block_until_ready(se_block(x_bf16, w1, w2))
    ref_bf16 = se_block_ref(x_bf16.astype(jnp.float32), w1, w2)
    assert jnp.allclose(out_bf16.astype(jnp.float32), ref_bf16, atol=5e-2, rtol=5e-2)

    print("KERNEL_OK")
</pallas_src>

<mosaic_0001>
module attributes {stable_mosaic.version = 11 : i64} {
  func.func @_se_kernel(%arg0: i32, %arg1: memref<2x64x256xf32, #tpu.memory_space<vmem>>, %arg2: memref<4x64xf32, #tpu.memory_space<vmem>>, %arg3: memref<64x4xf32, #tpu.memory_space<vmem>>, %arg4: memref<2x64x256xf32, #tpu.memory_space<vmem>>, %arg5: memref<2x64x1xf32, #tpu.memory_space<vmem>>) attributes {dimension_semantics = [#tpu.dimension_semantics<parallel>], iteration_bounds = array<i64: 1>, scalar_prefetch = 0 : i64, scratch_operands = 1 : i64, tpu.core_type = #tpu.core_type<tc>, window_params = [{transform_indices = @transform_0, window_bounds = array<i64: 2, 64, 256>}, {pipeline_mode = #tpu.pipeline_mode<synchronous>, transform_indices = @transform_1, window_bounds = array<i64: 4, 64>}, {pipeline_mode = #tpu.pipeline_mode<synchronous>, transform_indices = @transform_2, window_bounds = array<i64: 64, 4>}, {transform_indices = @transform_3, window_bounds = array<i64: 2, 64, 256>}]} {
    %c0 = arith.constant 0 : index
    %c0_0 = arith.constant 0 : index
    %c0_1 = arith.constant 0 : index
    %0 = vector.load %arg1[%c0, %c0_0, %c0_1] : memref<2x64x256xf32, #tpu.memory_space<vmem>>, vector<2x64x256xf32>
    %cst = arith.constant dense<0.000000e+00> : vector<2x64xf32>
    %1 = vector.multi_reduction <add>, %0, %cst [2] : vector<2x64x256xf32> to vector<2x64xf32>
    %cst_2 = arith.constant 3.906250e-03 : f32
    %2 = vector.broadcast %cst_2 : f32 to vector<2x64xf32>
    %3 = arith.mulf %1, %2 : vector<2x64xf32>
    %c0_3 = arith.constant 0 : index
    %c0_4 = arith.constant 0 : index
    %4 = vector.load %arg2[%c0_3, %c0_4] : memref<4x64xf32, #tpu.memory_space<vmem>>, vector<4x64xf32>
    %c0_5 = arith.constant 0 : index
    %c0_6 = arith.constant 0 : index
    %5 = vector.load %arg3[%c0_5, %c0_6] : memref<64x4xf32, #tpu.memory_space<vmem>>, vector<64x4xf32>
    %6 = vector.shape_cast %3 : vector<2x64xf32> to vector<2x1x64xf32>
    %7 = vector.shape_cast %4 : vector<4x64xf32> to vector<1x4x64xf32>
    %8 = vector.broadcast %6 : vector<2x1x64xf32> to vector<2x4x64xf32>
    %9 = vector.broadcast %7 : vector<1x4x64xf32> to vector<2x4x64xf32>
    %10 = arith.mulf %8, %9 : vector<2x4x64xf32>
    %cst_7 = arith.constant dense<0.000000e+00> : vector<2x4xf32>
    %11 = vector.multi_reduction <add>, %10, %cst_7 [2] : vector<2x4x64xf32> to vector<2x4xf32>
    %cst_8 = arith.constant 0.000000e+00 : f32
    %12 = vector.broadcast %cst_8 : f32 to vector<2x4xf32>
    %13 = arith.maximumf %11, %12 : vector<2x4xf32>
    %14 = vector.shape_cast %13 : vector<2x4xf32> to vector<2x1x4xf32>
    %15 = vector.shape_cast %5 : vector<64x4xf32> to vector<1x64x4xf32>
    %16 = vector.broadcast %14 : vector<2x1x4xf32> to vector<2x64x4xf32>
    %17 = vector.broadcast %15 : vector<1x64x4xf32> to vector<2x64x4xf32>
    %18 = arith.mulf %16, %17 : vector<2x64x4xf32>
    %cst_9 = arith.constant dense<0.000000e+00> : vector<2x64xf32>
    %19 = vector.multi_reduction <add>, %18, %cst_9 [2] : vector<2x64x4xf32> to vector<2x64xf32>
    %20 = arith.negf %19 : vector<2x64xf32>
    %21 = math.exp %20 : vector<2x64xf32>
    %cst_10 = arith.constant 1.000000e+00 : f32
    %22 = vector.broadcast %cst_10 : f32 to vector<2x64xf32>
    %23 = arith.addf %22, %21 : vector<2x64xf32>
    %24 = arith.divf %22, %23 : vector<2x64xf32>
    %25 = vector.shape_cast %24 : vector<2x64xf32> to vector<2x64x1xf32>
    %c0_11 = arith.constant 0 : index
    %c0_12 = arith.constant 0 : index
    %c0_13 = arith.constant 0 : index
    %26 = vector.load %arg5[%c0_11, %c0_12, %c0_13] : memref<2x64x1xf32, #tpu.memory_space<vmem>>, vector<2x64x1xf32>
    tpu.vector_store %arg5[%c0_11, %c0_12, %c0_13], %25 {strides = array<i32>} : memref<2x64x1xf32, #tpu.memory_space<vmem>>, vector<2x64x1xf32>,
    %c0_i32 = arith.constant 0 : i32
    %c32_i32 = arith.constant 32 : i32
    %27 = arith.muli %c0_i32, %c32_i32 : i32
    %28 = tpu.assume_multiple %27, 32 : i32
    %c0_14 = arith.constant 0 : index
    %29 = arith.index_cast %28 : i32 to index
    %c0_15 = arith.constant 0 : index
    %30 = vector.load %arg1[%c0_14, %29, %c0_15] : memref<2x64x256xf32, #tpu.memory_space<vmem>>, vector<2x32x256xf32>
    %c0_16 = arith.constant 0 : index
    %31 = arith.index_cast %28 : i32 to index
    %c0_17 = arith.constant 0 : index
    %32 = vector.load %arg5[%c0_16, %31, %c0_17] : memref<2x64x1xf32, #tpu.memory_space<vmem>>, vector<2x32x1xf32>
    %33 = vector.broadcast %32 : vector<2x32x1xf32> to vector<2x32x256xf32>
    %34 = arith.mulf %30, %33 : vector<2x32x256xf32>
    %c0_18 = arith.constant 0 : index
    %35 = arith.index_cast %28 : i32 to index
    %c0_19 = arith.constant 0 : index
    %36 = vector.load %arg4[%c0_18, %35, %c0_19] : memref<2x64x256xf32, #tpu.memory_space<vmem>>, vector<2x32x256xf32>
    tpu.vector_store %arg4[%c0_18, %35, %c0_19], %34 {strides = array<i32>} : memref<2x64x256xf32, #tpu.memory_space<vmem>>, vector<2x32x256xf32>,
    %c1_i32 = arith.constant 1 : i32
    %c32_i32_20 = arith.constant 32 : i32
    %37 = arith.muli %c1_i32, %c32_i32_20 : i32
    %38 = tpu.assume_multiple %37, 32 : i32
    %c0_21 = arith.constant 0 : index
    %39 = arith.index_cast %38 : i32 to index
    %c0_22 = arith.constant 0 : index
    %40 = vector.load %arg1[%c0_21, %39, %c0_22] : memref<2x64x256xf32, #tpu.memory_space<vmem>>, vector<2x32x256xf32>
    %c0_23 = arith.constant 0 : index
    %41 = arith.index_cast %38 : i32 to index
    %c0_24 = arith.constant 0 : index
    %42 = vector.load %arg5[%c0_23, %41, %c0_24] : memref<2x64x1xf32, #tpu.memory_space<vmem>>, vector<2x32x1xf32>
    %43 = vector.broadcast %42 : vector<2x32x1xf32> to vector<2x32x256xf32>
    %44 = arith.mulf %40, %43 : vector<2x32x256xf32>
    %c0_25 = arith.constant 0 : index
    %45 = arith.index_cast %38 : i32 to index
    %c0_26 = arith.constant 0 : index
    %46 = vector.load %arg4[%c0_25, %45, %c0_26] : memref<2x64x256xf32, #tpu.memory_space<vmem>>, vector<2x32x256xf32>
    tpu.vector_store %arg4[%c0_25, %45, %c0_26], %44 {strides = array<i32>} : memref<2x64x256xf32, #tpu.memory_space<vmem>>, vector<2x32x256xf32>,
    %c2_i32 = arith.constant 2 : i32
    return
  }
  func.func @transform_0(%arg0: i32) -> (i32, i32, i32) {
    %c0_i32 = arith.constant 0 : i32
    %c0_i32_0 = arith.constant 0 : i32
    %c0_i32_1 = arith.constant 0 : i32
    return %arg0, %c0_i32, %c0_i32_0 : i32, i32, i32
  }
  func.func @transform_1(%arg0: i32) -> (i32, i32) {
    %c0_i32 = arith.constant 0 : i32
    %c0_i32_0 = arith.constant 0 : i32
    %c0_i32_1 = arith.constant 0 : i32
    return %c0_i32, %c0_i32_0 : i32, i32
  }
  func.func @transform_2(%arg0: i32) -> (i32, i32) {
    %c0_i32 = arith.constant 0 : i32
    %c0_i32_0 = arith.constant 0 : i32
    %c0_i32_1 = arith.constant 0 : i32
    return %c0_i32, %c0_i32_0 : i32, i32
  }
  func.func @transform_3(%arg0: i32) -> (i32, i32, i32) {
    %c0_i32 = arith.constant 0 : i32
    %c0_i32_0 = arith.constant 0 : i32
    %c0_i32_1 = arith.constant 0 : i32
    return %arg0, %c0_i32, %c0_i32_0 : i32, i32, i32
  }
}

</mosaic_0001>

<bundles_post_ra>
// kernel: tpu_custom_call.1
= control target key start
LH: loop header
LB: loop body
LE: loop exit
PB: predicated region body
PF: predicated region fallthrough
CT: control target
= control target key end

     0   :  { %8 = vsyncpa [#allocation4], 0  ;;  %s4894_s0 = inlined_call_operand.hbm [shape: f32[2,64,256], index: 0, kind: input, shape index: {}]   ;;  %s4895_s1 = inlined_call_operand.vmem [shape: f32[4,64], index: 1, kind: input, shape index: {}]   ;;  %s4896_s2 = inlined_call_operand.vmem [shape: f32[64,4], index: 2, kind: input, shape index: {}]   ;;  %s4897_s3 = inlined_call_operand.hbm [shape: f32[2,64,256], index: 3, kind: output, shape index: {}]  }
   0x1   :  { %9 = vsyncpa [#allocation5], 0  ;;  %s3294_s12 = smov [#allocation3]  }
   0x2   :  { %s15_s13 = sshll.u32 %s3294_s12, 4  ;;  %s16_s13 = int_to_ptr.vmem [resolvable:$true] %s15_s13 }
   0x3   :  { %s3258_s14 = scalar_lea.vmem %s16_s13, 4096  ;;  %p3263_p1 = scmp.lt.s32.totalorder %s16_s13, %s16_s13 }
   0x4   :  { %p3259_p0 = scmp.ne.s32.totalorder %s16_s13, %s3258_s14  ;;  %p3264_p2 = scmp.lt.s32.totalorder %s3258_s14, %s3258_s14 }
   0x6   :  { %p3265_p3 = por %p3264_p2, %p3263_p1 }
   0x8   :  { %p3266_p4 = pnand %p3265_p3, %p3259_p0 }
   0xa   :  { %3269 = shalt.err (!%p3266_p4)
}
   0xb   :  { %s3295_s15 = smov 256   ;;  %s3296_s16 = smov 16  }
   0xc   :  { %21 = dma.hbm_to_vmem [thread:$0]  %s4894_s0, 4096, %s16_s13, [#allocation4], %s3295_s15, %s3295_s15, %s3296_s16  }
   0xd   :  { %3290 = dma.done.wait [#allocation4], 4096  }
   0xe   :  { %3291 = vsyncadd [#allocation4], 4294963200  ;;  %v33_v0 = vld [vmem:[#allocation3 + $0x20] sm:$0xff]  ;;  %v34_v1 = vld [vmem:[#allocation3 + $0x28] sm:$0xff]  ;;  %v135_v48 = vlaneseq  ;;  %v3297_v53 = vmov 0   ;;  %vm638_vm0 = vcmask 130112  }
   0xf   :  { %v29_v2 = vld [vmem:[#allocation3] sm:$0xff]  ;;  %v67_v3 = vadd.f32 %v34_v1, %v33_v0  ;;  %v30_v4 = vld [vmem:[#allocation3 + $0x8] sm:$0xff]  ;;  %v35_v5 = vld [vmem:[#allocation3 + $0x30] sm:$0xff]  ;;  %3185 = vset.pattern.permute.xlu1 %v3297_v53  ;;  %3184 = vset.pattern.permute.xlu0 %v3297_v53  ;;  %vm645_vm1 = vcmask 195712   ;;  %vm652_vm2 = vcmask 261312   ;;  %vm659_vm3 = vcmask 326912  }
  0x10   :  { %v36_v6 = vld [vmem:[#allocation3 + $0x38] sm:$0xff]  ;;  %v61_v7 = vadd.f32 %v30_v4, %v29_v2  ;;  %v31_v8 = vld [vmem:[#allocation3 + $0x10] sm:$0xff]  ;;  %v37_v14 = vld [vmem:[#allocation3 + $0x40] sm:$0xff]  ;;  %v3326_v49 = vshrl.u32 %v135_v48, 7  ;;  %vm666_vm4 = vcmask 392512   ;;  %vm673_vm5 = vcmask 458112  }
  0x11   :  { %v32_v9 = vld [vmem:[#allocation3 + $0x18] sm:$0xff]  ;;  %68 = vadd.xlane.f32.xlu1 %v67_v3  ;;  %v70_v10 = vadd.f32 %v36_v6, %v35_v5  ;;  %v39_v12 = vld [vmem:[#allocation3 + $0x50] sm:$0xff]  ;;  %v38_v15 = vld [vmem:[#allocation3 + $0x48] sm:$0xff]  ;;  %vm680_vm6 = vcmask 523712   ;;  %vm955_vm7 = vcmask 1041409   ;;  %vm957_vm8 = vcmask 1042434  }
  0x12   :  { %62 = vadd.xlane.f32.xlu0 %v61_v7  ;;  %v64_v11 = vadd.f32 %v32_v9, %v31_v8  ;;  %v40_v13 = vld [vmem:[#allocation3 + $0x58] sm:$0xff]  ;;  %v73_v17 = vadd.f32 %v38_v15, %v37_v14  ;;  %v43_v18 = vld [vmem:[#allocation3 + $0x70] sm:$0xff]  ;;  %v41_v20 = vld [vmem:[#allocation3 + $0x60] sm:$0xff]  ;;  %v3329_v50 = vsub.s32 0, %v3326_v49  ;;  %v3336_v54 = vsub.s32 1, %v3326_v49 }
  0x13   :  { %v76_v16 = vadd.f32 %v40_v13, %v39_v12  ;;  %v44_v19 = vld [vmem:[#allocation3 + $0x78] sm:$0xff]  ;;  %v42_v21 = vld [vmem:[#allocation3 + $0x68] sm:$0xff]  ;;  %v47_v24 = vld [vmem:[#allocation3 + $0x90] sm:$0xff]  ;;  %v3340_v56 = vsub.s32 2, %v3326_v49  ;;  %v3344_v58 = vsub.s32 3, %v3326_v49  ;;  %vm959_vm9 = vcmask 1043459  }
  0x14   :  { %v82_v22 = vadd.f32 %v44_v19, %v43_v18  ;;  %v79_v23 = vadd.f32 %v42_v21, %v41_v20  ;;  %v48_v25 = vld [vmem:[#allocation3 + $0x98] sm:$0xff]  ;;  %v45_v26 = vld [vmem:[#allocation3 + $0x80] sm:$0xff]  ;;  %v46_v27 = vld [vmem:[#allocation3 + $0x88] sm:$0xff]  ;;  %vm966_vm10 = vcmask 519168   ;;  %vm2650_vm11 = vcmask 1044484  }
  0x15   :  { %71 = vadd.xlane.f32.xlu1 %v70_v10  ;;  %v88_v28 = vadd.f32 %v48_v25, %v47_v24  ;;  %v85_v29 = vadd.f32 %v46_v27, %v45_v26  ;;  %v51_v30 = vld [vmem:[#allocation3 + $0xb0] sm:$0xff]  ;;  %v52_v31 = vld [vmem:[#allocation3 + $0xb8] sm:$0xff]  ;;  %v49_v32 = vld [vmem:[#allocation3 + $0xa0] sm:$0xff]  ;;  %vm2652_vm12 = vcmask 1045509   ;;  %vm2654_vm13 = vcmask 1046534  }
  0x16   :  { %65 = vadd.xlane.f32.xlu0 %v64_v11  ;;  %v50_v33 = vld [vmem:[#allocation3 + $0xa8] sm:$0xff]  ;;  %v94_v34 = vadd.f32 %v52_v31, %v51_v30  ;;  %v55_v36 = vld [vmem:[#allocation3 + $0xd0] sm:$0xff]  ;;  %v56_v37 = vld [vmem:[#allocation3 + $0xd8] sm:$0xff]  ;;  %vm2656_vm14 = vcmask 1047559   ;;  %vm2779_vm15 = vcmask 31744  }
  0x17   :  { %v91_v35 = vadd.f32 %v50_v33, %v49_v32  ;;  %v53_v38 = vld [vmem:[#allocation3 + $0xc0] sm:$0xff]  ;;  %v54_v39 = vld [vmem:[#allocation3 + $0xc8] sm:$0xff]  ;;  %v100_v40 = vadd.f32 %v56_v37, %v55_v36  ;;  %v59_v42 = vld [vmem:[#allocation3 + $0xf0] sm:$0xff] }
  0x18   :  { %v97_v41 = vadd.f32 %v54_v39, %v53_v38  ;;  %v60_v43 = vld [vmem:[#allocation3 + $0xf8] sm:$0xff]  ;;  %v57_v44 = vld [vmem:[#allocation3 + $0xe0] sm:$0xff]  ;;  %v58_v45 = vld [vmem:[#allocation3 + $0xe8] sm:$0xff] }
  0x19   :  { %77 = vadd.xlane.f32.xlu1 %v76_v16  ;;  %v106_v46 = vadd.f32 %v60_v43, %v59_v42  ;;  %v103_v47 = vadd.f32 %v58_v45, %v57_v44  ;;  %v125_v51 = vld [vmem:[%s4895_s1] sm:$0xf] }
  0x1a   :  { %74 = vadd.xlane.f32.xlu0 %v73_v17  ;;  %v138_v52 = vrot.slane %v125_v51, %v3329_v50  ;;  %v173_v55 = vrot.slane %v125_v51, %v3336_v54  ;;  %v208_v57 = vrot.slane %v125_v51, %v3340_v56  ;;  %v243_v59 = vrot.slane %v125_v51, %v3344_v58 }
  0x1d   :  { %83 = vadd.xlane.f32.xlu1 %v82_v22 }
  0x1e   :  { %80 = vadd.xlane.f32.xlu0 %v79_v23 }
  0x21   :  { %89 = vadd.xlane.f32.xlu1 %v88_v28 }
  0x22   :  { %86 = vadd.xlane.f32.xlu0 %v85_v29 }
  0x25   :  { %95 = vadd.xlane.f32.xlu1 %v94_v34 }
  0x26   :  { %92 = vadd.xlane.f32.xlu0 %v91_v35 }
  0x29   :  { %101 = vadd.xlane.f32.xlu1 %v100_v40 }
  0x2a   :  { %98 = vadd.xlane.f32.xlu0 %v97_v41 }
  0x2d   :  { %107 = vadd.xlane.f32.xlu1 %v106_v46 }
  0x2e   :  { %104 = vadd.xlane.f32.xlu0 %v103_v47 }
  0x3e   :  { %144 = vbcast.lane.b32.xlu1 %v138_v52, 264 }
  0x42   :  { %148 = vbcast.lane.b32.xlu1 %v138_v52, 272 }
  0x44   :  { %140 = vbcast.lane.b32.xlu0 %v138_v52, 256 }
  0x46   :  { %152 = vbcast.lane.b32.xlu1 %v138_v52, 280 }
  0x48   :  { %156 = vbcast.lane.b32.xlu0 %v138_v52, 288 }
  0x4a   :  { %160 = vbcast.lane.b32.xlu1 %v138_v52, 296 }
  0x4c   :  { %164 = vbcast.lane.b32.xlu0 %v138_v52, 304 }
  0x4e   :  { %168 = vbcast.lane.b32.xlu1 %v138_v52, 312 }
  0x50   :  { %175 = vbcast.lane.b32.xlu0 %v173_v55, 256 }
  0x52   :  { %179 = vbcast.lane.b32.xlu1 %v173_v55, 264 }
  0x54   :  { %183 = vbcast.lane.b32.xlu0 %v173_v55, 272 }
  0x56   :  { %187 = vbcast.lane.b32.xlu1 %v173_v55, 280 }
  0x58   :  { %191 = vbcast.lane.b32.xlu0 %v173_v55, 288 }
  0x5a   :  { %195 = vbcast.lane.b32.xlu1 %v173_v55, 296 }
  0x5c   :  { %199 = vbcast.lane.b32.xlu0 %v173_v55, 304 }
  0x5e   :  { %203 = vbcast.lane.b32.xlu1 %v173_v55, 312 }
  0x60   :  { %210 = vbcast.lane.b32.xlu0 %v208_v57, 256 }
  0x62   :  { %214 = vbcast.lane.b32.xlu1 %v208_v57, 264 }
  0x64   :  { %218 = vbcast.lane.b32.xlu0 %v208_v57, 272 }
  0x66   :  { %222 = vbcast.lane.b32.xlu1 %v208_v57, 280 }
  0x68   :  { %226 = vbcast.lane.b32.xlu0 %v208_v57, 288 }
  0x6a   :  { %230 = vbcast.lane.b32.xlu1 %v208_v57, 296 }
  0x6c   :  { %234 = vbcast.lane.b32.xlu0 %v208_v57, 304 }
  0x6e   :  { %238 = vbcast.lane.b32.xlu1 %v208_v57, 312 }
  0x70   :  { %245 = vbcast.lane.b32.xlu0 %v243_v59, 256 }
  0x72   :  { %249 = vbcast.lane.b32.xlu1 %v243_v59, 264 }
  0x74   :  { %253 = vbcast.lane.b32.xlu0 %v243_v59, 272 }
  0x76   :  { %257 = vbcast.lane.b32.xlu1 %v243_v59, 280 }
  0x78   :  { %261 = vbcast.lane.b32.xlu0 %v243_v59, 288 }
  0x7a   :  { %265 = vbcast.lane.b32.xlu1 %v243_v59, 296 }
  0x7c   :  { %269 = vbcast.lane.b32.xlu0 %v243_v59, 304 }
  0x7e   :  { %273 = vbcast.lane.b32.xlu1 %v243_v59, 312 }
  0x9a   :  { %v69_v60 = vpop.xlane.xlu1 %68 }
  0x9b   :  { %v63_v61 = vpop.xlane.xlu0 %62  ;;  %v3375_v18 = vmul.f32 0.00390625, %v69_v60 }
  0x9c   :  { %v3365_v13 = vmul.f32 0.00390625, %v63_v61 }
  0x9e   :  { %v72_v62 = vpop.xlane.xlu1 %71 }
  0x9f   :  { %v66_v63 = vpop.xlane.xlu0 %65  ;;  %v3383_v22 = vmul.f32 0.00390625, %v72_v62 }
  0xa0   :  { %v3363_v12 = vmul.f32 0.00390625, %v66_v63 }
  0xa2   :  { %v78_v0 = vpop.xlane.xlu1 %77 }
  0xa3   :  { %v75_v1 = vpop.xlane.xlu0 %74  ;;  %v3395_v28 = vmul.f32 0.00390625, %v78_v0 }
  0xa4   :  { %v3385_v23 = vmul.f32 0.00390625, %v75_v1 }
  0xa6   :  { %v84_v2 = vpop.xlane.xlu1 %83 }
  0xa7   :  { %v81_v3 = vpop.xlane.xlu0 %80  ;;  %v3407_v34 = vmul.f32 0.00390625, %v84_v2 }
  0xa8   :  { %v3397_v29 = vmul.f32 0.00390625, %v81_v3 }
  0xaa   :  { %v3347_v4 = vpop.xlane.xlu1 %89 }
  0xab   :  { %v3349_v5 = vpop.xlane.xlu0 %86 }
  0xae   :  { %v3351_v6 = vpop.xlane.xlu1 %95 }
  0xaf   :  { %v3353_v7 = vpop.xlane.xlu0 %92 }
  0xb2   :  { %v3355_v8 = vpop.xlane.xlu1 %101 }
  0xb3   :  { %v3357_v9 = vpop.xlane.xlu0 %98 }
  0xb6   :  { %v3359_v10 = vpop.xlane.xlu1 %107 }
  0xb7   :  { %v3361_v11 = vpop.xlane.xlu0 %104 }
  0xba   :  { %v3367_v14 = vpop.permute.xlu1 %144 }
  0xbb   :  { %v308_v15 = vmul.f32 %v3367_v14, %v3363_v12  ;;  %v3371_v16 = vpop.permute.xlu0 %140 }
  0xbc   :  { %v307_v17 = vmul.f32 %v3371_v16, %v3365_v13 }
  0xbd   :  { %439 = vperm.xlu1 %3185, %v308_v15  }
  0xbe   :  { %436 = vperm.xlu0 %3184, %v307_v17   ;;  %v3377_v19 = vpop.permute.xlu1 %148 }
  0xbf   :  { %v309_v20 = vmul.f32 %v3377_v19, %v3375_v18  ;;  %v3381_v21 = vpop.permute.xlu0 %156 }
  0xc0   :  { %v311_v25 = vmul.f32 %v3381_v21, %v3385_v23 }
  0xc1   :  { %442 = vperm.xlu1 %3185, %v309_v20  }
  0xc2   :  { %v3387_v24 = vpop.permute.xlu1 %152 }
  0xc3   :  { %v310_v26 = vmul.f32 %v3387_v24, %v3383_v22  ;;  %v3393_v27 = vpop.permute.xlu0 %164 }
  0xc4   :  { %v313_v31 = vmul.f32 %v3393_v27, %v3397_v29 }
  0xc5   :  { %445 = vperm.xlu0 %3184, %v310_v26   ;;  %448 = vperm.xlu1 %3185, %v311_v25  }
  0xc6   :  { %v3399_v30 = vpop.permute.xlu1 %160 }
  0xc7   :  { %v312_v32 = vmul.f32 %v3399_v30, %v3395_v28  ;;  %v3405_v33 = vpop.permute.xlu0 %175 }
  0xc8   :  { %v315_v36 = vmul.f32 %v3405_v33, %v3365_v13 }
  0xc9   :  { %451 = vperm.xlu0 %3184, %v312_v32   ;;  %454 = vperm.xlu1 %3185, %v313_v31  }
  0xca   :  { %v3409_v35 = vpop.permute.xlu1 %168 }
  0xcb   :  { %v314_v37 = vmul.f32 %v3409_v35, %v3407_v34  ;;  %v3415_v38 = vpop.permute.xlu0 %183 }
  0xcc   :  { %v317_v40 = vmul.f32 %v3415_v38, %v3375_v18 }
  0xcd   :  { %457 = vperm.xlu0 %3184, %v314_v37   ;;  %460 = vperm.xlu1 %3185, %v315_v36  }
  0xce   :  { %v3417_v39 = vpop.permute.xlu1 %179 }
  0xcf   :  { %v316_v41 = vmul.f32 %v3417_v39, %v3363_v12  ;;  %v3423_v42 = vpop.permute.xlu0 %191 }
  0xd0   :  { %v319_v44 = vmul.f32 %v3423_v42, %v3385_v23 }
  0xd1   :  { %463 = vperm.xlu0 %3184, %v316_v41   ;;  %466 = vperm.xlu1 %3185, %v317_v40  }
  0xd2   :  { %v3425_v43 = vpop.permute.xlu1 %187 }
  0xd3   :  { %v318_v45 = vmul.f32 %v3425_v43, %v3383_v22  ;;  %v3431_v46 = vpop.permute.xlu0 %199 }
  0xd4   :  { %v321_v51 = vmul.f32 %v3431_v46, %v3397_v29 }
  0xd5   :  { %469 = vperm.xlu0 %3184, %v318_v45   ;;  %472 = vperm.xlu1 %3185, %v319_v44  }
  0xd6   :  { %v3433_v47 = vpop.permute.xlu1 %195 }
  0xd7   :  { %v320_v52 = vmul.f32 %v3433_v47, %v3395_v28  ;;  %v3439_v53 = vpop.permute.xlu0 %210 }
  0xd8   :  { %v323_v57 = vmul.f32 %v3439_v53, %v3365_v13 }
  0xd9   :  { %475 = vperm.xlu0 %3184, %v320_v52   ;;  %478 = vperm.xlu1 %3185, %v321_v51  }
  0xda   :  { %v3441_v55 = vpop.permute.xlu1 %203 }
  0xdb   :  { %v322_v59 = vmul.f32 %v3441_v55, %v3407_v34  ;;  %v3447_v60 = vpop.permute.xlu0 %218 }
  0xdc   :  { %v325_v62 = vmul.f32 %v3447_v60, %v3375_v18 }
  0xdd   :  { %481 = vperm.xlu0 %3184, %v322_v59   ;;  %484 = vperm.xlu1 %3185, %v323_v57  }
  0xde   :  { %v3449_v61 = vpop.permute.xlu1 %214 }
  0xdf   :  { %v324_v63 = vmul.f32 %v3449_v61, %v3363_v12  ;;  %v3455_v0 = vpop.permute.xlu0 %226 }
  0xe0   :  { %v327_v2 = vmul.f32 %v3455_v0, %v3385_v23 }
  0xe1   :  { %487 = vperm.xlu0 %3184, %v324_v63   ;;  %490 = vperm.xlu1 %3185, %v325_v62   ;;  %v117_v62 = vmul.f32 0.00390625, %v3349_v5  ;;  %v120_v5 = vmul.f32 0.00390625, %v3351_v6  ;;  %v124_v6 = vmul.f32 0.00390625, %v3359_v10 }
  0xe2   :  { %v3457_v1 = vpop.permute.xlu1 %222 }
  0xe3   :  { %v326_v3 = vmul.f32 %v3457_v1, %v3383_v22  ;;  %v3463_v15 = vpop.permute.xlu0 %234 }
  0xe4   :  { %v329_v20 = vmul.f32 %v3463_v15, %v3397_v29 }
  0xe5   :  { %493 = vperm.xlu0 %3184, %v326_v3   ;;  %496 = vperm.xlu1 %3185, %v327_v2   ;;  %v118_v2 = vmul.f32 0.00390625, %v3347_v4  ;;  %v119_v3 = vmul.f32 0.00390625, %v3353_v7  ;;  %v122_v4 = vmul.f32 0.00390625, %v3355_v8  ;;  %v123_v7 = vmul.f32 0.00390625, %v3361_v11 }
  0xe6   :  { %v3465_v17 = vpop.permute.xlu1 %230 }
  0xe7   :  { %v328_v25 = vmul.f32 %v3465_v17, %v3395_v28  ;;  %v3471_v26 = vpop.permute.xlu0 %245  ;;  %v349_v8 = vmul.f32 %v3415_v38, %v119_v3  ;;  %v348_v11 = vmul.f32 %v3417_v39, %v118_v2  ;;  %v353_v10 = vmul.f32 %v3431_v46, %v123_v7 }
  0xe8   :  { %v331_v32 = vmul.f32 %v3471_v26, %v3365_v13  ;;  %v357_v38 = vmul.f32 %v3447_v60, %v119_v3  ;;  %v356_v39 = vmul.f32 %v3449_v61, %v118_v2  ;;  %v361_v46 = vmul.f32 %v3463_v15, %v123_v7 }
  0xe9   :  { %499 = vperm.xlu0 %3184, %v328_v25   ;;  %502 = vperm.xlu1 %3185, %v329_v20   ;;  %v121_v20 = vmul.f32 0.00390625, %v3357_v9  ;;  %v347_v9 = vmul.f32 %v3405_v33, %v117_v62  ;;  %v355_v33 = vmul.f32 %v3439_v53, %v117_v62  ;;  %v363_v53 = vmul.f32 %v3471_v26, %v117_v62 }
  0xea   :  { %v3473_v31 = vpop.permute.xlu1 %238 }
  0xeb   :  { %v330_v36 = vmul.f32 %v3473_v31, %v3407_v34  ;;  %v3479_v37 = vpop.permute.xlu0 %253 }
  0xec   :  { %v333_v41 = vmul.f32 %v3479_v37, %v3375_v18  ;;  %v365_v60 = vmul.f32 %v3479_v37, %v119_v3 }
  0xed   :  { %505 = vperm.xlu0 %3184, %v330_v36   ;;  %508 = vperm.xlu1 %3185, %v331_v32  }
  0xee   :  { %v3481_v40 = vpop.permute.xlu1 %249 }
  0xef   :  { %v332_v44 = vmul.f32 %v3481_v40, %v3363_v12  ;;  %v3487_v45 = vpop.permute.xlu0 %261  ;;  %v364_v61 = vmul.f32 %v3481_v40, %v118_v2 }
  0xf0   :  { %v335_v51 = vmul.f32 %v3487_v45, %v3385_v23 }
  0xf1   :  { %511 = vperm.xlu0 %3184, %v332_v44   ;;  %514 = vperm.xlu1 %3185, %v333_v41  }
  0xf2   :  { %v3489_v13 = vpop.permute.xlu1 %257 }
  0xf3   :  { %v334_v52 = vmul.f32 %v3489_v13, %v3383_v22  ;;  %v3495_v57 = vpop.permute.xlu0 %269  ;;  %v339_v22 = vmul.f32 %v3371_v16, %v117_v62  ;;  %v343_v16 = vmul.f32 %v3381_v21, %v121_v20  ;;  %v346_v21 = vmul.f32 %v3409_v35, %v124_v6 }
  0xf4   :  { %v337_v12 = vmul.f32 %v3495_v57, %v3397_v29  ;;  %v340_v29 = vmul.f32 %v3367_v14, %v118_v2  ;;  %v345_v14 = vmul.f32 %v3393_v27, %v123_v7  ;;  %v350_v27 = vmul.f32 %v3425_v43, %v120_v5 }
  0xf5   :  { %517 = vperm.xlu0 %3184, %v334_v52   ;;  %520 = vperm.xlu1 %3185, %v335_v51   ;;  %v354_v35 = vmul.f32 %v3441_v55, %v124_v6  ;;  %v358_v43 = vmul.f32 %v3457_v1, %v120_v5  ;;  %v362_v55 = vmul.f32 %v3473_v31, %v124_v6 }
  0xf6   :  { %v3497_v18 = vpop.permute.xlu1 %265  ;;  %v366_v1 = vmul.f32 %v3489_v13, %v120_v5  ;;  %v369_v15 = vmul.f32 %v3495_v57, %v123_v7 }
  0xf7   :  { %v336_v59 = vmul.f32 %v3497_v18, %v3395_v28  ;;  %v341_v28 = vmul.f32 %v3377_v19, %v119_v3  ;;  %v344_v19 = vmul.f32 %v3399_v30, %v122_v4  ;;  %v352_v30 = vmul.f32 %v3433_v47, %v122_v4 }
  0xf8   :  { %v360_v47 = vmul.f32 %v3465_v17, %v122_v4  ;;  %v368_v17 = vmul.f32 %v3497_v18, %v122_v4 }
  0xf9   :  { %523 = vperm.xlu0 %3184, %v336_v59   ;;  %526 = vperm.xlu1 %3185, %v337_v12  }
  0xfa   :  { %v3504_v23 = vpop.permute.xlu1 %273 }
  0xfb   :  { %v338_v63 = vmul.f32 %v3504_v23, %v3407_v34  ;;  %v342_v34 = vmul.f32 %v3387_v24, %v120_v5  ;;  %v351_v24 = vmul.f32 %v3423_v42, %v121_v20  ;;  %v359_v42 = vmul.f32 %v3455_v0, %v121_v20 }
  0xfc   :  { %v367_v0 = vmul.f32 %v3487_v45, %v121_v20  ;;  %v370_v26 = vmul.f32 %v3504_v23, %v124_v6  ;;  %v628_v23 = vand.u32 127, %v135_v48 }
  0xfd   :  { %529 = vperm.xlu0 %3184, %v338_v63   ;;  %532 = vperm.xlu1 %3185, %v339_v22  }
  0xfe   :  { %v633_v2 = vadd.s32 4294967288, %v628_v23  ;;  %v654_v5 = vadd.s32 4294967264, %v628_v23  ;;  %v668_v7 = vadd.s32 4294967248, %v628_v23  ;;  %v3582_v48 = vsub.s32 %v628_v23, %v3326_v49 }
 0x100   :  { %v3575_v20 = vsub.s32 %v633_v2, %v3326_v49  ;;  %4910 = vst [vmem:[#allocation9_spill] sm:$0xff] %v3582_v48 }
 0x101   :  { %535 = vperm.xlu0 %3184, %v340_v29   ;;  %538 = vperm.xlu1 %3185, %v341_v28   ;;  %v640_v28 = vadd.s32 4294967280, %v628_v23 }
 0x103   :  { %v3586_v6 = vsub.s32 %v640_v28, %v3326_v49 }
 0x105   :  { %541 = vperm.xlu0 %3184, %v342_v34   ;;  %544 = vperm.xlu1 %3185, %v343_v16   ;;  %v647_v16 = vadd.s32 4294967272, %v628_v23 }
 0x109   :  { %547 = vperm.xlu0 %3184, %v344_v19   ;;  %550 = vperm.xlu1 %3185, %v345_v14   ;;  %v661_v14 = vadd.s32 4294967256, %v628_v23 }
 0x10d   :  { %553 = vperm.xlu0 %3184, %v346_v21   ;;  %556 = vperm.xlu1 %3185, %v347_v9   ;;  %v3589_v9 = vsub.s32 %v654_v5, %v3326_v49  ;;  %v3592_v21 = vsub.s32 %v647_v16, %v3326_v49 }
 0x111   :  { %559 = vperm.xlu0 %3184, %v348_v11   ;;  %562 = vperm.xlu1 %3185, %v349_v8  }
 0x115   :  { %565 = vperm.xlu0 %3184, %v350_v27   ;;  %568 = vperm.xlu1 %3185, %v351_v24  }
 0x119   :  { %571 = vperm.xlu0 %3184, %v352_v30   ;;  %574 = vperm.xlu1 %3185, %v353_v10   ;;  %v3599_v10 = vsub.s32 %v668_v7, %v3326_v49  ;;  %v3602_v30 = vsub.s32 %v661_v14, %v3326_v49 }
 0x11d   :  { %577 = vperm.xlu0 %3184, %v354_v35   ;;  %580 = vperm.xlu1 %3185, %v355_v33   ;;  %v675_v35 = vadd.s32 4294967240, %v628_v23 }
 0x121   :  { %583 = vperm.xlu0 %3184, %v356_v39   ;;  %586 = vperm.xlu1 %3185, %v357_v38  }
 0x125   :  { %589 = vperm.xlu0 %3184, %v358_v43   ;;  %592 = vperm.xlu1 %3185, %v359_v42  }
 0x129   :  { %595 = vperm.xlu0 %3184, %v360_v47   ;;  %598 = vperm.xlu1 %3185, %v361_v46  }
 0x12d   :  { %601 = vperm.xlu0 %3184, %v362_v55   ;;  %604 = vperm.xlu1 %3185, %v363_v53  }
 0x131   :  { %607 = vperm.xlu0 %3184, %v364_v61   ;;  %610 = vperm.xlu1 %3185, %v365_v60  }
 0x135   :  { %613 = vperm.xlu0 %3184, %v366_v1   ;;  %616 = vperm.xlu1 %3185, %v367_v0  }
 0x138   :  { %v3546_v25 = vpop.permute.xlu1 %439 }
 0x139   :  { %619 = vperm.xlu0 %3184, %v368_v17   ;;  %622 = vperm.xlu1 %3185, %v369_v15   ;;  %v3549_v31 = vpop.permute.xlu0 %436  ;;  %v637_v43 = vrot.slane %v3546_v25, %v3575_v20 }
 0x13a   :  { %v632_v46 = vrot.slane %v3549_v31, %v3582_v48  ;;  %v3625_v31 = vsub.s32 %v675_v35, %v3326_v49 }
 0x13c   :  { %v3551_v32 = vpop.permute.xlu1 %442 }
 0x13d   :  { %625 = vperm.xlu0 %3184, %v370_v26   ;;  %v644_v53 = vrot.slane %v3551_v32, %v3586_v6 }
 0x140   :  { %v3553_v36 = vpop.permute.xlu1 %448  ;;  %v3555_v37 = vpop.permute.xlu0 %445 }
 0x141   :  { %v651_v55 = vrot.slane %v3555_v37, %v3592_v21  ;;  %v658_v23 = vrot.slane %v3553_v36, %v3589_v9 }
 0x144   :  { %v3557_v40 = vpop.permute.xlu1 %454  ;;  %v3559_v41 = vpop.permute.xlu0 %451 }
 0x148   :  { %v461_v44 = vpop.permute.xlu1 %460  ;;  %v3561_v45 = vpop.permute.xlu0 %457 }
 0x149   :  { %v685_v8 = vrot.slane %v461_v44, %v3582_v48 }
 0x14c   :  { %v467_v13 = vpop.permute.xlu1 %466  ;;  %v464_v51 = vpop.permute.xlu0 %463 }
 0x14d   :  { %v689_v19 = vrot.slane %v464_v51, %v3575_v20  ;;  %v694_v33 = vrot.slane %v467_v13, %v3586_v6  ;;  %v639_v13 = vsel %vm638_vm0, %v637_v43, %v632_v46 }
 0x14f   :  { %v690_v38 = vsel %vm638_vm0, %v689_v19, %v685_v8 }
 0x150   :  { %v3563_v52 = vpop.permute.xlu1 %472  ;;  %v470_v57 = vpop.permute.xlu0 %469  ;;  %v695_v17 = vsel %vm645_vm1, %v694_v33, %v690_v38 }
 0x151   :  { %v699_v39 = vrot.slane %v470_v57, %v3592_v21  ;;  %v704_v15 = vrot.slane %v3563_v52, %v3589_v9 }
 0x153   :  { %v700_v32 = vsel %vm652_vm2, %v699_v39, %v695_v17 }
 0x154   :  { %v3565_v18 = vpop.permute.xlu1 %478  ;;  %v3567_v12 = vpop.permute.xlu0 %475  ;;  %v705_v28 = vsel %vm659_vm3, %v704_v15, %v700_v32 }
 0x155   :  { %v709_v37 = vrot.slane %v3567_v12, %v3602_v30  ;;  %v714_v16 = vrot.slane %v3565_v18, %v3599_v10 }
 0x157   :  { %v710_v36 = vsel %vm666_vm4, %v709_v37, %v705_v28 }
 0x158   :  { %v485_v59 = vpop.permute.xlu1 %484  ;;  %v3569_v62 = vpop.permute.xlu0 %481 }
 0x159   :  { %v724_v42 = vrot.slane %v485_v59, %v3582_v48  ;;  %v646_v59 = vsel %vm645_vm1, %v644_v53, %v639_v13  ;;  %v719_v14 = vrot.slane %v3569_v62, %v3625_v31 }
 0x15c   :  { %v491_v22 = vpop.permute.xlu1 %490  ;;  %v488_v63 = vpop.permute.xlu0 %487 }
 0x15d   :  { %v728_v11 = vrot.slane %v488_v63, %v3575_v20  ;;  %v733_v47 = vrot.slane %v491_v22, %v3586_v6 }
 0x15f   :  { %v729_v60 = vsel %vm638_vm0, %v728_v11, %v724_v42  ;;  %v672_v11 = vrot.slane %v3557_v40, %v3599_v10  ;;  %v715_v40 = vsel %vm673_vm5, %v714_v16, %v710_v36  ;;  %v3715_v36 = vsub.s32 6, %v3326_v49 }
 0x160   :  { %v3572_v3 = vpop.permute.xlu1 %496  ;;  %v494_v29 = vpop.permute.xlu0 %493  ;;  %v734_v52 = vsel %vm645_vm1, %v733_v47, %v729_v60  ;;  %v720_v46 = vsel %vm680_vm6, %v719_v14, %v715_v40 }
 0x161   :  { %v738_v61 = vrot.slane %v494_v29, %v3592_v21  ;;  %v743_v51 = vrot.slane %v3572_v3, %v3589_v9  ;;  %v653_v29 = vsel %vm652_vm2, %v651_v55, %v646_v59  ;;  %v665_v3 = vrot.slane %v3559_v41, %v3602_v30 }
 0x162   :  { %v660_v18 = vsel %vm659_vm3, %v658_v23, %v653_v29 }
 0x163   :  { %v739_v22 = vsel %vm652_vm2, %v738_v61, %v734_v52  ;;  %v667_v62 = vsel %vm666_vm4, %v665_v3, %v660_v18  ;;  %v3708_v3 = vsub.s32 4, %v3326_v49 }
 0x164   :  { %v3577_v34 = vpop.permute.xlu1 %502  ;;  %v3579_v4 = vpop.permute.xlu0 %499  ;;  %v744_v41 = vsel %vm659_vm3, %v743_v51, %v739_v22  ;;  %v674_v53 = vsel %vm673_vm5, %v672_v11, %v667_v62  ;;  %v3701_v22 = vld [vmem:[%s4896_s2] sm:$0xff] }
 0x165   :  { %v748_v12 = vrot.slane %v3579_v4, %v3602_v30  ;;  %v753_v19 = vrot.slane %v3577_v34, %v3599_v10  ;;  %v679_v34 = vrot.slane %v3561_v45, %v3625_v31  ;;  %v1000_v29 = vrot.slane %v3701_v22, %v3340_v56 }
 0x166   :  { %v1014_v16 = vrot.slane %v3701_v22, %v3708_v3  ;;  %v1028_v14 = vrot.slane %v3701_v22, %v3715_v36 }
 0x167   :  { %v681_v61 = vsel %vm680_vm6, %v679_v34, %v674_v53 }
 0x168   :  { %v509_v24 = vpop.permute.xlu1 %508  ;;  %v3596_v27 = vpop.permute.xlu0 %505  ;;  %v956_v15 = vsel %vm955_vm7, %v720_v46, %v681_v61 }
 0x169   :  { %v763_v25 = vrot.slane %v509_v24, %v3582_v48  ;;  %v749_v24 = vsel %vm666_vm4, %v748_v12, %v744_v41  ;;  %v758_v33 = vrot.slane %v3596_v27, %v3625_v31  ;;  %v993_v12 = vrot.slane %v3701_v22, %v3336_v54 }
 0x16a   :  { %v754_v27 = vsel %vm673_vm5, %v753_v19, %v749_v24 }
 0x16b   :  { %v759_v45 = vsel %vm680_vm6, %v758_v33, %v754_v27 }
 0x16c   :  { %v515_v0 = vpop.permute.xlu1 %514  ;;  %v512_v1 = vpop.permute.xlu0 %511 }
 0x16d   :  { %v767_v26 = vrot.slane %v512_v1, %v3575_v20  ;;  %v772_v44 = vrot.slane %v515_v0, %v3586_v6 }
 0x16f   :  { %v768_v57 = vsel %vm638_vm0, %v767_v26, %v763_v25  ;;  %v958_v25 = vsel %vm957_vm8, %v759_v45, %v956_v15  ;;  %v3749_v45 = vld [vmem:[%s4896_s2 + $0x10] sm:$0xff] }
 0x170   :  { %v521_v63 = vpop.permute.xlu1 %520  ;;  %v518_v2 = vpop.permute.xlu0 %517  ;;  %v773_v4 = vsel %vm645_vm1, %v772_v44, %v768_v57 }
 0x171   :  { %v777_v5 = vrot.slane %v518_v2, %v3592_v21  ;;  %v782_v7 = vrot.slane %v521_v63, %v3589_v9 }
 0x173   :  { %v778_v8 = vsel %vm652_vm2, %v777_v5, %v773_v4 }
 0x174   :  { %v527_v35 = vpop.permute.xlu1 %526  ;;  %v524_v38 = vpop.permute.xlu0 %523  ;;  %v783_v43 = vsel %vm659_vm3, %v782_v7, %v778_v8  ;;  %v3728_v8 = vld [vmem:[%s4896_s2 + $0x8] sm:$0xff] }
 0x175   :  { %v787_v39 = vrot.slane %v524_v38, %v3602_v30  ;;  %v792_v42 = vrot.slane %v527_v35, %v3599_v10  ;;  %v1042_v11 = vrot.slane %v3728_v8, %v3329_v50  ;;  %v1056_v33 = vrot.slane %v3728_v8, %v3340_v56 }
 0x176   :  { %v1070_v62 = vrot.slane %v3728_v8, %v3708_v3 }
 0x177   :  { %v788_v47 = vsel %vm666_vm4, %v787_v39, %v783_v43 }
 0x178   :  { %v3676_v55 = vpop.permute.xlu1 %532  ;;  %v530_v60 = vpop.permute.xlu0 %529  ;;  %v793_v1 = vsel %vm673_vm5, %v792_v42, %v788_v47  ;;  %v1084_v42 = vrot.slane %v3728_v8, %v3715_v36 }
 0x179   :  { %v797_v0 = vrot.slane %v530_v60, %v3625_v31  ;;  %v802_v61 = vrot.slane %v3676_v55, %v3582_v48 }
 0x17b   :  { %v798_v17 = vsel %vm680_vm6, %v797_v0, %v793_v1 }
 0x17c   :  { %v3684_v26 = vpop.permute.xlu1 %538  ;;  %v536_v32 = vpop.permute.xlu0 %535  ;;  %v960_v37 = vsel %vm959_vm9, %v798_v17, %v958_v25 }
 0x17d   :  { %v967_v44 = vsel %vm966_vm10, %v960_v37, 0.0  ;;  %v806_v43 = vrot.slane %v536_v32, %v3575_v20  ;;  %v811_v17 = vrot.slane %v3684_v26, %v3586_v6  ;;  %v1098_v32 = vrot.slane %v3749_v45, %v3329_v50 }
 0x17e   :  { %968 = vadd.xlane.f32.xlu1 %v967_v44 }
 0x17f   :  { %v807_v37 = vsel %vm638_vm0, %v806_v43, %v802_v61 }
 0x180   :  { %v3688_v13 = vpop.permute.xlu1 %544  ;;  %v3690_v51 = vpop.permute.xlu0 %541 }
 0x181   :  { %v816_v55 = vrot.slane %v3690_v51, %v3592_v21 }
 0x184   :  { %v3692_v52 = vpop.permute.xlu1 %550  ;;  %v3694_v57 = vpop.permute.xlu0 %547 }
 0x188   :  { %v557_v59 = vpop.permute.xlu1 %556  ;;  %v3696_v23 = vpop.permute.xlu0 %553 }
 0x189   :  { %v841_v46 = vrot.slane %v557_v59, %v3582_v48 }
 0x18c   :  { %v563_v63 = vpop.permute.xlu1 %562  ;;  %v560_v2 = vpop.permute.xlu0 %559 }
 0x18d   :  { %v845_v40 = vrot.slane %v560_v2, %v3575_v20  ;;  %v850_v60 = vrot.slane %v563_v63, %v3586_v6 }
 0x18f   :  { %995 = vbcast.lane.b32.xlu1 %v993_v12, 256  ;;  %v846_v0 = vsel %vm638_vm0, %v845_v40, %v841_v46  ;;  %v826_v40 = vrot.slane %v3694_v57, %v3602_v30 }
 0x190   :  { %v3710_v28 = vpop.permute.xlu1 %568  ;;  %v566_v5 = vpop.permute.xlu0 %565  ;;  %v851_v2 = vsel %vm645_vm1, %v850_v60, %v846_v0 }
 0x191   :  { %v855_v1 = vrot.slane %v566_v5, %v3592_v21  ;;  %v860_v26 = vrot.slane %v3710_v28, %v3589_v9 }
 0x193   :  { %1002 = vbcast.lane.b32.xlu1 %v1000_v29, 256 }
 0x194   :  { %v3717_v7 = vpop.permute.xlu1 %574  ;;  %v3719_v4 = vpop.permute.xlu0 %571 }
 0x195   :  { %v865_v51 = vrot.slane %v3719_v4, %v3602_v30  ;;  %v812_v4 = vsel %vm645_vm1, %v811_v17, %v807_v37 }
 0x197   :  { %1016 = vbcast.lane.b32.xlu1 %v1014_v16, 256  ;;  %v856_v16 = vsel %vm652_vm2, %v855_v1, %v851_v2 }
 0x198   :  { %v581_v19 = vpop.permute.xlu1 %580  ;;  %v3723_v41 = vpop.permute.xlu0 %577 }
 0x199   :  { %v880_v15 = vrot.slane %v581_v19, %v3582_v48  ;;  %v1112_v19 = vrot.slane %v3749_v45, %v3340_v56 }
 0x19b   :  { %1030 = vbcast.lane.b32.xlu1 %v1028_v14, 256 }
 0x19c   :  { %v587_v18 = vpop.permute.xlu1 %586  ;;  %v584_v24 = vpop.permute.xlu0 %583 }
 0x19d   :  { %v884_v27 = vrot.slane %v584_v24, %v3575_v20  ;;  %v889_v25 = vrot.slane %v587_v18, %v3586_v6  ;;  %v821_v24 = vrot.slane %v3688_v13, %v3589_v9  ;;  %v870_v13 = vrot.slane %v3717_v7, %v3599_v10 }
 0x19f   :  { %1044 = vbcast.lane.b32.xlu1 %v1042_v11, 256  ;;  %v885_v44 = vsel %vm638_vm0, %v884_v27, %v880_v15 }
 0x1a0   :  { %v593_v35 = vpop.permute.xlu1 %592  ;;  %v590_v38 = vpop.permute.xlu0 %589  ;;  %v890_v28 = vsel %vm645_vm1, %v889_v25, %v885_v44  ;;  %v1140_v44 = vrot.slane %v3749_v45, %v3715_v36 }
 0x1a1   :  { %v894_v59 = vrot.slane %v590_v38, %v3592_v21  ;;  %v899_v11 = vrot.slane %v593_v35, %v3589_v9  ;;  %v817_v35 = vsel %vm652_vm2, %v816_v55, %v812_v4 }
 0x1a2   :  { %v822_v7 = vsel %vm659_vm3, %v821_v24, %v817_v35  ;;  %v986_v24 = vrot.slane %v3701_v22, %v3329_v50  ;;  %v3868_v35 = vsub.s32 7, %v3326_v49 }
 0x1a3   :  { %1058 = vbcast.lane.b32.xlu1 %v1056_v33, 256  ;;  %v827_v15 = vsel %vm666_vm4, %v826_v40, %v822_v7  ;;  %v3873_v40 = vld [vmem:[%s4896_s2 + $0x28] sm:$0xff] }
 0x1a4   :  { %v3736_v34 = vpop.permute.xlu1 %598  ;;  %v596_v39 = vpop.permute.xlu0 %595 }
 0x1a5   :  { %v904_v33 = vrot.slane %v596_v39, %v3602_v30  ;;  %v909_v60 = vrot.slane %v3736_v34, %v3599_v10  ;;  %v836_v34 = vrot.slane %v3696_v23, %v3625_v31 }
 0x1a7   :  { %1072 = vbcast.lane.b32.xlu1 %v1070_v62, 256 }
 0x1a8   :  { %v605_v47 = vpop.permute.xlu1 %604  ;;  %v3744_v53 = vpop.permute.xlu0 %601 }
 0x1a9   :  { %v919_v29 = vrot.slane %v605_v47, %v3582_v48  ;;  %v875_v47 = vrot.slane %v3723_v41, %v3625_v31  ;;  %v914_v0 = vrot.slane %v3744_v53, %v3625_v31 }
 0x1ab   :  { %1086 = vbcast.lane.b32.xlu1 %v1084_v42, 256  ;;  %v861_v42 = vsel %vm659_vm3, %v860_v26, %v856_v16 }
 0x1ac   :  { %v611_v12 = vpop.permute.xlu1 %610  ;;  %v608_v63 = vpop.permute.xlu0 %607  ;;  %v866_v46 = vsel %vm666_vm4, %v865_v51, %v861_v42  ;;  %v1266_v42 = vrot.slane %v3873_v40, %v3329_v50 }
 0x1ad   :  { %v923_v5 = vrot.slane %v608_v63, %v3575_v20  ;;  %v928_v14 = vrot.slane %v611_v12, %v3586_v6  ;;  %v1126_v20 = vrot.slane %v3749_v45, %v3708_v3  ;;  %v895_v6 = vsel %vm652_vm2, %v894_v59, %v890_v28  ;;  %v3848_v28 = vld [vmem:[%s4896_s2 + $0x20] sm:$0xff] }
 0x1ae   :  { %v900_v57 = vsel %vm659_vm3, %v899_v11, %v895_v6  ;;  %v871_v25 = vsel %vm673_vm5, %v870_v13, %v866_v46  ;;  %v1238_v4 = vrot.slane %v3848_v28, %v3708_v3  ;;  %v1007_v6 = vrot.slane %v3701_v22, %v3344_v58 }
 0x1af   :  { %v924_v18 = vsel %vm638_vm0, %v923_v5, %v919_v29  ;;  %1100 = vbcast.lane.b32.xlu1 %v1098_v32, 256  ;;  %v876_v37 = vsel %vm680_vm6, %v875_v47, %v871_v25  ;;  %v1280_v13 = vrot.slane %v3873_v40, %v3340_v56  ;;  %v1294_v46 = vrot.slane %v3873_v40, %v3708_v3  ;;  %v3894_v47 = vld [vmem:[%s4896_s2 + $0x30] sm:$0xff] }
 0x1b0   :  { %v617_v38 = vpop.permute.xlu1 %616  ;;  %v614_v62 = vpop.permute.xlu0 %613  ;;  %v929_v39 = vsel %vm645_vm1, %v928_v14, %v924_v18  ;;  %v1210_v18 = vrot.slane %v3848_v28, %v3329_v50  ;;  %v1350_v7 = vrot.slane %v3894_v47, %v3708_v3  ;;  %vm2924_vm0 = vcmask 7168  }
 0x1b1   :  { %v933_v43 = vrot.slane %v614_v62, %v3592_v21  ;;  %v938_v27 = vrot.slane %v617_v38, %v3589_v9  ;;  %v831_v21 = vrot.slane %v3692_v52, %v3599_v10  ;;  %v905_v9 = vsel %vm666_vm4, %v904_v33, %v900_v57 }
 0x1b2   :  { %v910_v55 = vsel %vm673_vm5, %v909_v60, %v905_v9  ;;  %v3861_v33 = vsub.s32 5, %v3326_v49  ;;  %v1252_v38 = vrot.slane %v3848_v28, %v3715_v36  ;;  %v1049_v49 = vrot.slane %v3728_v8, %v3336_v54 }
 0x1b3   :  { %v934_v61 = vsel %vm652_vm2, %v933_v43, %v929_v39  ;;  %1114 = vbcast.lane.b32.xlu1 %v1112_v19, 256  ;;  %v832_v23 = vsel %vm673_vm5, %v831_v21, %v827_v15  ;;  %v1035_v43 = vrot.slane %v3701_v22, %v3868_v35  ;;  %v1322_v60 = vrot.slane %v3894_v47, %v3329_v50 }
 0x1b4   :  { %v623_v1 = vpop.permute.xlu1 %622  ;;  %v620_v41 = vpop.permute.xlu0 %619  ;;  %v939_v32 = vsel %vm659_vm3, %v938_v27, %v934_v61  ;;  %v837_v12 = vsel %vm680_vm6, %v836_v34, %v832_v23  ;;  %v1021_v62 = vrot.slane %v3701_v22, %v3861_v33  ;;  %v1063_v27 = vrot.slane %v3728_v8, %v3344_v58 }
 0x1b5   :  { %v943_v17 = vrot.slane %v620_v41, %v3602_v30  ;;  %v948_v52 = vrot.slane %v623_v1, %v3599_v10  ;;  %v915_v30 = vsel %vm680_vm6, %v914_v0, %v910_v55  ;;  %v3827_v10 = vld [vmem:[%s4896_s2 + $0x18] sm:$0xff]  ;;  %v961_v2 = vsel %vm955_vm7, %v876_v37, %v837_v12 }
 0x1b6   :  { %v962_v5 = vsel %vm957_vm8, %v915_v30, %v961_v2  ;;  %v1154_v16 = vrot.slane %v3827_v10, %v3329_v50  ;;  %v1182_v19 = vrot.slane %v3827_v10, %v3708_v3  ;;  %v1196_v11 = vrot.slane %v3827_v10, %v3715_v36  ;;  %v3915_v1 = vld [vmem:[%s4896_s2 + $0x38] sm:$0xff]  ;;  %s3298_s2 = smov [#allocation6]  }
 0x1b7   :  { %v944_v53 = vsel %vm666_vm4, %v943_v17, %v939_v32  ;;  %1128 = vbcast.lane.b32.xlu1 %v1126_v20, 256  ;;  %v1224_v20 = vrot.slane %v3848_v28, %v3340_v56  ;;  %v1308_v22 = vrot.slane %v3873_v40, %v3715_v36  ;;  %v1077_v39 = vrot.slane %v3728_v8, %v3861_v33  ;;  %s3149_s8 = sshll.u32 %s3298_s2, 4  ;;  %s3150_s8 = int_to_ptr.vmem [resolvable:$true] %s3149_s8 }
 0x1b8   :  { %v626_v59 = vpop.permute.xlu0 %625  ;;  %v949_v26 = vsel %vm673_vm5, %v948_v52, %v944_v53  ;;  %v1091_v57 = vrot.slane %v3728_v8, %v3868_v35  ;;  %v1336_v61 = vrot.slane %v3894_v47, %v3340_v56  ;;  %v1105_v21 = vrot.slane %v3749_v45, %v3336_v54  ;;  %s3270_s9 = scalar_lea.vmem %s3150_s8, 4096  ;;  %p3275_p6 = scmp.lt.s32.totalorder %s3150_s8, %s3150_s8 }
 0x1b9   :  { %v953_v63 = vrot.slane %v626_v59, %v3625_v31  ;;  %v1168_v31 = vrot.slane %v3827_v10, %v3340_v56  ;;  %v1119_v9 = vrot.slane %v3749_v45, %v3344_v58  ;;  %v1364_v8 = vrot.slane %v3894_v47, %v3715_v36  ;;  %p3271_p5 = scmp.ne.s32.totalorder %s3150_s8, %s3270_s9  ;;  %p3276_p7 = scmp.lt.s32.totalorder %s3270_s9, %s3270_s9 }
 0x1ba   :  { %v1133_v0 = vrot.slane %v3749_v45, %v3861_v33  ;;  %v1378_v41 = vrot.slane %v3915_v1, %v3329_v50  ;;  %v1147_v15 = vrot.slane %v3749_v45, %v3868_v35  ;;  %v1392_v34 = vrot.slane %v3915_v1, %v3340_v56 }
 0x1bb   :  { %v954_v29 = vsel %vm680_vm6, %v953_v63, %v949_v26  ;;  %1142 = vbcast.lane.b32.xlu1 %v1140_v44, 256  ;;  %v1161_v17 = vrot.slane %v3827_v10, %v3336_v54  ;;  %v1406_v25 = vrot.slane %v3915_v1, %v3708_v3  ;;  %v1175_v50 = vrot.slane %v3827_v10, %v3344_v58  ;;  %p3277_p8 = por %p3276_p7, %p3275_p6 }
 0x1bc   :  { %v963_v51 = vsel %vm959_vm9, %v954_v29, %v962_v5  ;;  %v1420_v45 = vrot.slane %v3915_v1, %v3715_v36  ;;  %v1189_v56 = vrot.slane %v3827_v10, %v3861_v33  ;;  %v1203_v32 = vrot.slane %v3827_v10, %v3868_v35 }
 0x1bd   :  { %v970_v14 = vsel %vm966_vm10, %v963_v51, 0.0  ;;  %v1217_v3 = vrot.slane %v3848_v28, %v3336_v54  ;;  %v1231_v36 = vrot.slane %v3848_v28, %v3344_v58  ;;  %v1245_v53 = vrot.slane %v3848_v28, %v3861_v33  ;;  %p3278_p9 = pnand %p3277_p8, %p3271_p5 }
 0x1be   :  { %971 = vadd.xlane.f32.xlu0 %v970_v14  ;;  %v1259_v23 = vrot.slane %v3848_v28, %v3868_v35  ;;  %v1273_v59 = vrot.slane %v3873_v40, %v3336_v54  ;;  %v1287_v10 = vrot.slane %v3873_v40, %v3344_v58  ;;  %v1301_v63 = vrot.slane %v3873_v40, %v3861_v33 }
 0x1bf   :  { %1156 = vbcast.lane.b32.xlu1 %v1154_v16, 256  ;;  %v1315_v2 = vrot.slane %v3873_v40, %v3868_v35  ;;  %v1329_v29 = vrot.slane %v3894_v47, %v3336_v54  ;;  %v1343_v16 = vrot.slane %v3894_v47, %v3344_v58  ;;  %v1357_v14 = vrot.slane %v3894_v47, %v3861_v33 }
 0x1c3   :  { %1170 = vbcast.lane.b32.xlu1 %v1168_v31, 256  ;;  %v1371_v31 = vrot.slane %v3894_v47, %v3868_v35 }
 0x1c7   :  { %1184 = vbcast.lane.b32.xlu1 %v1182_v19, 256 }
 0x1cb   :  { %1198 = vbcast.lane.b32.xlu1 %v1196_v11, 256  ;;  %v1385_v11 = vrot.slane %v3915_v1, %v3336_v54  ;;  %v1427_v54 = vrot.slane %v3915_v1, %v3868_v35 }
 0x1cf   :  { %1212 = vbcast.lane.b32.xlu1 %v1210_v18, 256  ;;  %v1399_v18 = vrot.slane %v3915_v1, %v3344_v58 }
 0x1d3   :  { %1226 = vbcast.lane.b32.xlu1 %v1224_v20, 256 }
 0x1d4   :  { %988 = vbcast.lane.b32.xlu0 %v986_v24, 256  ;;  %v1413_v24 = vrot.slane %v3915_v1, %v3861_v33 }
 0x1d7   :  { %1240 = vbcast.lane.b32.xlu1 %v1238_v4, 256 }
 0x1d8   :  { %1009 = vbcast.lane.b32.xlu0 %v1007_v6, 256 }
 0x1db   :  { %1254 = vbcast.lane.b32.xlu1 %v1252_v38, 256 }
 0x1dc   :  { %1023 = vbcast.lane.b32.xlu0 %v1021_v62, 256 }
 0x1df   :  { %1268 = vbcast.lane.b32.xlu1 %v1266_v42, 256 }
 0x1e0   :  { %1037 = vbcast.lane.b32.xlu0 %v1035_v43, 256 }
 0x1e3   :  { %1282 = vbcast.lane.b32.xlu1 %v1280_v13, 256 }
 0x1e4   :  { %1051 = vbcast.lane.b32.xlu0 %v1049_v49, 256 }
 0x1e7   :  { %1296 = vbcast.lane.b32.xlu1 %v1294_v46, 256 }
 0x1e8   :  { %1065 = vbcast.lane.b32.xlu0 %v1063_v27, 256 }
 0x1eb   :  { %1310 = vbcast.lane.b32.xlu1 %v1308_v22, 256 }
 0x1ec   :  { %1079 = vbcast.lane.b32.xlu0 %v1077_v39, 256 }
 0x1ef   :  { %1324 = vbcast.lane.b32.xlu1 %v1322_v60, 256 }
 0x1f0   :  { %1093 = vbcast.lane.b32.xlu0 %v1091_v57, 256 }
 0x1f3   :  { %1338 = vbcast.lane.b32.xlu1 %v1336_v61, 256 }
 0x1f4   :  { %1107 = vbcast.lane.b32.xlu0 %v1105_v21, 256 }
 0x1f7   :  { %1352 = vbcast.lane.b32.xlu1 %v1350_v7, 256 }
 0x1f8   :  { %1121 = vbcast.lane.b32.xlu0 %v1119_v9, 256 }
 0x1fb   :  { %1366 = vbcast.lane.b32.xlu1 %v1364_v8, 256 }
 0x1fc   :  { %1135 = vbcast.lane.b32.xlu0 %v1133_v0, 256 }
 0x1ff   :  { %1380 = vbcast.lane.b32.xlu1 %v1378_v41, 256 }
 0x200   :  { %1149 = vbcast.lane.b32.xlu0 %v1147_v15, 256 }
 0x203   :  { %1394 = vbcast.lane.b32.xlu1 %v1392_v34, 256 }
 0x204   :  { %1163 = vbcast.lane.b32.xlu0 %v1161_v17, 256 }
 0x207   :  { %v969_v52 = vpop.xlane.xlu1 %968  ;;  %1408 = vbcast.lane.b32.xlu1 %v1406_v25, 256 }
 0x208   :  { %1177 = vbcast.lane.b32.xlu0 %v1175_v50, 256  ;;  %v3991_v38 = vmax.f32 %v969_v52, 0.0 }
 0x20b   :  { %1422 = vbcast.lane.b32.xlu1 %v1420_v45, 256  ;;  %v3935_v37 = vpop.permute.xlu1 %995 }
 0x20c   :  { %1191 = vbcast.lane.b32.xlu0 %v1189_v56, 256  ;;  %v1496_v42 = vmul.f32 %v3935_v37, %v3991_v38 }
 0x20f   :  { %v3939_v55 = vpop.permute.xlu1 %1002 }
 0x210   :  { %1205 = vbcast.lane.b32.xlu0 %v1203_v32, 256  ;;  %v1497_v33 = vmul.f32 %v3939_v55, %v3991_v38 }
 0x213   :  { %v3945_v44 = vpop.permute.xlu1 %1016 }
 0x214   :  { %1219 = vbcast.lane.b32.xlu0 %v1217_v3, 256  ;;  %v1499_v35 = vmul.f32 %v3945_v44, %v3991_v38 }
 0x217   :  { %v3949_v30 = vpop.permute.xlu1 %1030 }
 0x218   :  { %1233 = vbcast.lane.b32.xlu0 %v1231_v36, 256  ;;  %v1501_v27 = vmul.f32 %v3949_v30, %v3991_v38 }
 0x21b   :  { %v3955_v12 = vpop.permute.xlu1 %1044 }
 0x21c   :  { %1247 = vbcast.lane.b32.xlu0 %v1245_v53, 256  ;;  %v1503_v60 = vmul.f32 %v3955_v12, %v3991_v38 }
 0x21f   :  { %v3959_v26 = vpop.permute.xlu1 %1058 }
 0x220   :  { %1261 = vbcast.lane.b32.xlu0 %v1259_v23, 256  ;;  %v1505_v7 = vmul.f32 %v3959_v26, %v3991_v38 }
 0x223   :  { %v3965_v5 = vpop.permute.xlu1 %1072 }
 0x224   :  { %1275 = vbcast.lane.b32.xlu0 %v1273_v59, 256  ;;  %v1507_v0 = vmul.f32 %v3965_v5, %v3991_v38 }
 0x227   :  { %v3969_v51 = vpop.permute.xlu1 %1086 }
 0x228   :  { %1289 = vbcast.lane.b32.xlu0 %v1287_v10, 256  ;;  %v1509_v34 = vmul.f32 %v3969_v51, %v3991_v38 }
 0x22b   :  { %v3975_v19 = vpop.permute.xlu1 %1100 }
 0x22c   :  { %1303 = vbcast.lane.b32.xlu0 %v1301_v63, 256  ;;  %v1511_v52 = vmul.f32 %v3975_v19, %v3991_v38 }
 0x22f   :  { %v3979_v28 = vpop.permute.xlu1 %1114 }
 0x230   :  { %1317 = vbcast.lane.b32.xlu0 %v1315_v2, 256  ;;  %v1513_v32 = vmul.f32 %v3979_v28, %v3991_v38 }
 0x233   :  { %v3987_v4 = vpop.permute.xlu1 %1128 }
 0x234   :  { %1331 = vbcast.lane.b32.xlu0 %v1329_v29, 256  ;;  %v1515_v23 = vmul.f32 %v3987_v4, %v3991_v38 }
 0x237   :  { %v3997_v58 = vpop.permute.xlu1 %1142 }
 0x238   :  { %1345 = vbcast.lane.b32.xlu0 %v1343_v16, 256  ;;  %v1517_v2 = vmul.f32 %v3997_v58, %v3991_v38 }
 0x23b   :  { %v4007_v13 = vpop.permute.xlu1 %1156 }
 0x23c   :  { %1359 = vbcast.lane.b32.xlu0 %v1357_v14, 256  ;;  %v1519_v14 = vmul.f32 %v4007_v13, %v3991_v38 }
 0x23f   :  { %v4017_v22 = vpop.permute.xlu1 %1170 }
 0x240   :  { %1373 = vbcast.lane.b32.xlu0 %v1371_v31, 256 }
 0x243   :  { %v4029_v21 = vpop.permute.xlu1 %1184 }
 0x244   :  { %1387 = vbcast.lane.b32.xlu0 %v1385_v11, 256 }
 0x247   :  { %v3983_v20 = vpop.xlane.xlu0 %971  ;;  %v4039_v1 = vpop.permute.xlu1 %1198 }
 0x248   :  { %1401 = vbcast.lane.b32.xlu0 %v1399_v18, 256 }
 0x24b   :  { %v3989_v6 = vpop.permute.xlu0 %988  ;;  %v4051_v50 = vpop.permute.xlu1 %1212 }
 0x24c   :  { %1415 = vbcast.lane.b32.xlu0 %v1413_v24, 256  ;;  %v1495_v62 = vmul.f32 %v3989_v6, %v3991_v38  ;;  %v1521_v24 = vmul.f32 %v4017_v22, %v3991_v38 }
 0x24e   :  { %1752 = vperm.xlu1 %3185, %v1495_v62  }
 0x24f   :  { %v3999_v40 = vpop.permute.xlu0 %1009  ;;  %v4061_v3 = vpop.permute.xlu1 %1226 }
 0x250   :  { %1429 = vbcast.lane.b32.xlu0 %v1427_v54, 256  ;;  %v1498_v49 = vmul.f32 %v3999_v40, %v3991_v38 }
 0x252   :  { %1758 = vperm.xlu1 %3185, %v1497_v33  }
 0x253   :  { %v4005_v43 = vpop.permute.xlu0 %1023  ;;  %v4073_v63 = vpop.permute.xlu1 %1240 }
 0x254   :  { %1755 = vperm.xlu0 %3184, %v1496_v42   ;;  %v1500_v39 = vmul.f32 %v4005_v43, %v3991_v38  ;;  %v1523_v42 = vmul.f32 %v4029_v21, %v3991_v38 }
 0x256   :  { %1764 = vperm.xlu1 %3185, %v1499_v35  }
 0x257   :  { %v4013_v46 = vpop.permute.xlu0 %1037  ;;  %v4083_v31 = vpop.permute.xlu1 %1254 }
 0x258   :  { %1761 = vperm.xlu0 %3184, %v1498_v49   ;;  %v1502_v57 = vmul.f32 %v4013_v46, %v3991_v38  ;;  %4911 = vst [vmem:[#allocation10_spill] sm:$0xff] %v4083_v31 }
 0x25a   :  { %1770 = vperm.xlu1 %3185, %v1501_v27   ;;  %v1525_v27 = vmul.f32 %v4039_v1, %v3991_v38 }
 0x25b   :  { %v4021_v47 = vpop.permute.xlu0 %1051  ;;  %v4095_v33 = vpop.permute.xlu1 %1268 }
 0x25c   :  { %1767 = vperm.xlu0 %3184, %v1500_v39   ;;  %v1504_v9 = vmul.f32 %v4021_v47, %v3991_v38 }
 0x25e   :  { %1776 = vperm.xlu1 %3185, %v1503_v60  }
 0x25f   :  { %v4027_v61 = vpop.permute.xlu0 %1065  ;;  %v4105_v39 = vpop.permute.xlu1 %1282 }
 0x260   :  { %1773 = vperm.xlu0 %3184, %v1502_v57   ;;  %v1506_v41 = vmul.f32 %v4027_v61, %v3991_v38 }
 0x262   :  { %1782 = vperm.xlu1 %3185, %v1505_v7   ;;  %v1527_v7 = vmul.f32 %v4051_v50, %v3991_v38 }
 0x263   :  { %v4035_v8 = vpop.permute.xlu0 %1079 }
 0x264   :  { %1779 = vperm.xlu0 %3184, %v1504_v9   ;;  %v1508_v17 = vmul.f32 %v4035_v8, %v3991_v38 }
 0x266   :  { %1788 = vperm.xlu1 %3185, %v1507_v0  }
 0x267   :  { %v4043_v15 = vpop.permute.xlu0 %1093 }
 0x268   :  { %1785 = vperm.xlu0 %3184, %v1506_v41   ;;  %v1510_v45 = vmul.f32 %v4043_v15, %v3991_v38  ;;  %v4117_v41 = vpop.permute.xlu1 %1296 }
 0x26a   :  { %1794 = vperm.xlu1 %3185, %v1509_v34   ;;  %v1529_v34 = vmul.f32 %v4061_v3, %v3991_v38 }
 0x26b   :  { %v4049_v25 = vpop.permute.xlu0 %1107 }
 0x26c   :  { %1791 = vperm.xlu0 %3184, %v1508_v17   ;;  %v1512_v36 = vmul.f32 %v4049_v25, %v3991_v38 }
 0x26e   :  { %1800 = vperm.xlu1 %3185, %v1511_v52  }
 0x26f   :  { %v4057_v56 = vpop.permute.xlu0 %1121 }
 0x270   :  { %1797 = vperm.xlu0 %3184, %v1510_v45   ;;  %v1514_v59 = vmul.f32 %v4057_v56, %v3991_v38  ;;  %v1531_v45 = vmul.f32 %v4073_v63, %v3991_v38 }
 0x272   :  { %1806 = vperm.xlu1 %3185, %v1513_v32   ;;  %v4127_v32 = vpop.permute.xlu1 %1310 }
 0x273   :  { %v4065_v53 = vpop.permute.xlu0 %1135  ;;  %4912 = vst [vmem:[#allocation11_spill] sm:$0xff] %v4127_v32 }
 0x274   :  { %1803 = vperm.xlu0 %3184, %v1512_v36   ;;  %v1516_v29 = vmul.f32 %v4065_v53, %v3991_v38 }
 0x276   :  { %1812 = vperm.xlu1 %3185, %v1515_v23  }
 0x277   :  { %v4071_v10 = vpop.permute.xlu0 %1149 }
 0x278   :  { %1809 = vperm.xlu0 %3184, %v1514_v59   ;;  %v1518_v11 = vmul.f32 %v4071_v10, %v3991_v38  ;;  %v1533_v59 = vmul.f32 %v4083_v31, %v3991_v38 }
 0x27a   :  { %1818 = vperm.xlu1 %3185, %v1517_v2  }
 0x27b   :  { %v4079_v16 = vpop.permute.xlu0 %1163 }
 0x27c   :  { %1815 = vperm.xlu0 %3184, %v1516_v29   ;;  %v1520_v54 = vmul.f32 %v4079_v16, %v3991_v38 }
 0x27e   :  { %1824 = vperm.xlu1 %3185, %v1519_v14   ;;  %v4139_v14 = vpop.permute.xlu1 %1324 }
 0x27f   :  { %v4087_v18 = vpop.permute.xlu0 %1177 }
 0x280   :  { %1821 = vperm.xlu0 %3184, %v1518_v11   ;;  %v1522_v35 = vmul.f32 %v4087_v18, %v3991_v38  ;;  %v1535_v11 = vmul.f32 %v4095_v33, %v3991_v38 }
 0x282   :  { %1830 = vperm.xlu1 %3185, %v1521_v24  }
 0x283   :  { %v4093_v62 = vpop.permute.xlu0 %1191 }
 0x284   :  { %1827 = vperm.xlu0 %3184, %v1520_v54   ;;  %v1524_v60 = vmul.f32 %v4093_v62, %v3991_v38 }
 0x286   :  { %1836 = vperm.xlu1 %3185, %v1523_v42   ;;  %v1537_v42 = vmul.f32 %v4105_v39, %v3991_v38 }
 0x287   :  { %v4101_v49 = vpop.permute.xlu0 %1205 }
 0x288   :  { %1833 = vperm.xlu0 %3184, %v1522_v35   ;;  %v1526_v9 = vmul.f32 %v4101_v49, %v3991_v38  ;;  %v4149_v35 = vpop.permute.xlu1 %1338 }
 0x28a   :  { %1842 = vperm.xlu1 %3185, %v1525_v27  }
 0x28b   :  { %v4109_v57 = vpop.permute.xlu0 %1219 }
 0x28c   :  { %1839 = vperm.xlu0 %3184, %v1524_v60   ;;  %v1528_v17 = vmul.f32 %v4109_v57, %v3991_v38 }
 0x28e   :  { %1848 = vperm.xlu1 %3185, %v1527_v7   ;;  %v1539_v7 = vmul.f32 %v4117_v41, %v3991_v38 }
 0x28f   :  { %v4115_v0 = vpop.permute.xlu0 %1233 }
 0x290   :  { %1845 = vperm.xlu0 %3184, %v1526_v9   ;;  %v1530_v36 = vmul.f32 %v4115_v0, %v3991_v38 }
 0x292   :  { %1854 = vperm.xlu1 %3185, %v1529_v34  }
 0x293   :  { %v4123_v52 = vpop.permute.xlu0 %1247 }
 0x294   :  { %1851 = vperm.xlu0 %3184, %v1528_v17   ;;  %v1532_v2 = vmul.f32 %v4123_v52, %v3991_v38  ;;  %v4161_v17 = vpop.permute.xlu1 %1352 }
 0x296   :  { %1860 = vperm.xlu1 %3185, %v1531_v45   ;;  %v1541_v45 = vmul.f32 %v4127_v32, %v3991_v38 }
 0x297   :  { %v4131_v23 = vpop.permute.xlu0 %1261 }
 0x298   :  { %4913 = vst [vmem:[#allocation12_spill] sm:$0xff] %v4131_v23  ;;  %1857 = vperm.xlu0 %3184, %v1530_v36   ;;  %v1534_v24 = vmul.f32 %v4131_v23, %v3991_v38 }
 0x29a   :  { %1866 = vperm.xlu1 %3185, %v1533_v59  }
 0x29b   :  { %v4137_v29 = vpop.permute.xlu0 %1275 }
 0x29c   :  { %1863 = vperm.xlu0 %3184, %v1532_v2   ;;  %v1536_v27 = vmul.f32 %v4137_v29, %v3991_v38  ;;  %v1543_v2 = vmul.f32 %v4139_v14, %v3991_v38 }
 0x29e   :  { %1872 = vperm.xlu1 %3185, %v1535_v11   ;;  %v4171_v11 = vpop.permute.xlu1 %1366 }
 0x29f   :  { %v4145_v54 = vpop.permute.xlu0 %1289  ;;  %4916 = vst [vmem:[#allocation15_spill] sm:$0xff] %v4171_v11 }
 0x2a0   :  { %1869 = vperm.xlu0 %3184, %v1534_v24   ;;  %v1538_v9 = vmul.f32 %v4145_v54, %v3991_v38 }
 0x2a2   :  { %1878 = vperm.xlu1 %3185, %v1537_v42  }
 0x2a3   :  { %v4153_v60 = vpop.permute.xlu0 %1303 }
 0x2a4   :  { %4914 = vst [vmem:[#allocation13_spill] sm:$0xff] %v4153_v60  ;;  %1875 = vperm.xlu0 %3184, %v1536_v27   ;;  %v1540_v36 = vmul.f32 %v4153_v60, %v3991_v38  ;;  %v1545_v27 = vmul.f32 %v4149_v35, %v3991_v38 }
 0x2a6   :  { %1884 = vperm.xlu1 %3185, %v1539_v7  }
 0x2a7   :  { %v4159_v34 = vpop.permute.xlu0 %1317 }
 0x2a8   :  { %4915 = vst [vmem:[#allocation14_spill] sm:$0xff] %v4159_v34  ;;  %1881 = vperm.xlu0 %3184, %v1538_v9   ;;  %v1542_v24 = vmul.f32 %v4159_v34, %v3991_v38 }
 0x2aa   :  { %1890 = vperm.xlu1 %3185, %v1541_v45   ;;  %v4183_v45 = vpop.permute.xlu1 %1380 }
 0x2ab   :  { %v4167_v59 = vpop.permute.xlu0 %1331 }
 0x2ac   :  { %1887 = vperm.xlu0 %3184, %v1540_v36   ;;  %v1544_v7 = vmul.f32 %v4167_v59, %v3991_v38  ;;  %v1547_v36 = vmul.f32 %v4161_v17, %v3991_v38 }
 0x2ae   :  { %1896 = vperm.xlu1 %3185, %v1543_v2   ;;  %v4193_v48 = vpop.permute.xlu1 %1394 }
 0x2af   :  { %v4175_v42 = vpop.permute.xlu0 %1345 }
 0x2b0   :  { %1893 = vperm.xlu0 %3184, %v1542_v24   ;;  %v1546_v34 = vmul.f32 %v4175_v42, %v3991_v38  ;;  %v1549_v24 = vmul.f32 %v4171_v11, %v3991_v38  ;;  %v1553_v11 = vmul.f32 %v4193_v48, %v3991_v38 }
 0x2b2   :  { %1902 = vperm.xlu1 %3185, %v1545_v27  }
 0x2b3   :  { %v4181_v9 = vpop.permute.xlu0 %1359 }
 0x2b4   :  { %4917 = vst [vmem:[#allocation16_spill] sm:$0xff] %v4181_v9  ;;  %1899 = vperm.xlu0 %3184, %v1544_v7   ;;  %v1548_v27 = vmul.f32 %v4181_v9, %v3991_v38  ;;  %v1551_v7 = vmul.f32 %v4183_v45, %v3991_v38 }
 0x2b6   :  { %1908 = vperm.xlu1 %3185, %v1547_v36   ;;  %v4205_v36 = vpop.permute.xlu1 %1408 }
 0x2b7   :  { %v4189_v2 = vpop.permute.xlu0 %1373  ;;  %4919 = vst [vmem:[#allocation18_spill] sm:$0xff] %v4205_v36 }
 0x2b8   :  { %4918 = vst [vmem:[#allocation17_spill] sm:$0xff] %v4189_v2  ;;  %1905 = vperm.xlu0 %3184, %v1546_v34   ;;  %v1550_v32 = vmul.f32 %v4189_v2, %v3991_v38 }
 0x2ba   :  { %1914 = vperm.xlu1 %3185, %v1549_v24   ;;  %v1555_v24 = vmul.f32 %v4205_v36, %v3991_v38  ;;  %v4215_v2 = vpop.permute.xlu1 %1422 }
 0x2bb   :  { %v4197_v23 = vpop.permute.xlu0 %1387  ;;  %4920 = vst [vmem:[#allocation19_spill] sm:$0xff] %v4215_v2 }
 0x2bc   :  { %1911 = vperm.xlu0 %3184, %v1548_v27   ;;  %v1552_v31 = vmul.f32 %v4197_v23, %v3991_v38 }
 0x2be   :  { %1920 = vperm.xlu1 %3185, %v1551_v7  }
 0x2bf   :  { %v4203_v34 = vpop.permute.xlu0 %1401 }
 0x2c0   :  { %1917 = vperm.xlu0 %3184, %v1550_v32   ;;  %v1554_v7 = vmul.f32 %v4203_v34, %v3991_v38  ;;  %v1557_v32 = vmul.f32 %v4215_v2, %v3991_v38 }
 0x2c2   :  { %1926 = vperm.xlu1 %3185, %v1553_v11  }
 0x2c3   :  { %v4213_v27 = vpop.permute.xlu0 %1415 }
 0x2c4   :  { %1923 = vperm.xlu0 %3184, %v1552_v31   ;;  %v1556_v60 = vmul.f32 %v4213_v27, %v3991_v38  ;;  %v4226_v31 = vmax.f32 %v3983_v20, 0.0 }
 0x2c6   :  { %1932 = vperm.xlu1 %3185, %v1555_v24   ;;  %v1559_v36 = vmul.f32 %v3989_v6, %v4226_v31  ;;  %v1561_v20 = vmul.f32 %v3939_v55, %v4226_v31  ;;  %v1563_v6 = vmul.f32 %v3945_v44, %v4226_v31  ;;  %v1564_v55 = vmul.f32 %v4005_v43, %v4226_v31 }
 0x2c7   :  { %v4228_v9 = vpop.permute.xlu0 %1429  ;;  %v1567_v44 = vmul.f32 %v3955_v12, %v4226_v31  ;;  %v1568_v43 = vmul.f32 %v4021_v47, %v4226_v31  ;;  %v1571_v12 = vmul.f32 %v3965_v5, %v4226_v31  ;;  %v1572_v47 = vmul.f32 %v4035_v8, %v4226_v31 }
 0x2c8   :  { %1929 = vperm.xlu0 %3184, %v1554_v7   ;;  %v1558_v24 = vmul.f32 %v4228_v9, %v3991_v38  ;;  %v1562_v38 = vmul.f32 %v3999_v40, %v4226_v31  ;;  %v1566_v40 = vmul.f32 %v4013_v46, %v4226_v31  ;;  %v1570_v46 = vmul.f32 %v4027_v61, %v4226_v31 }
 0x2c9   :  { %v4223_v11 = vpop.permute.xlu1 %1752  ;;  %v1575_v5 = vmul.f32 %v3975_v19, %v4226_v31  ;;  %v1574_v61 = vmul.f32 %v4043_v15, %v4226_v31  ;;  %v1576_v8 = vmul.f32 %v4049_v25, %v4226_v31  ;;  %v1579_v19 = vmul.f32 %v3987_v4, %v4226_v31 }
 0x2ca   :  { %4921 = vst [vmem:[#allocation20_spill] sm:$0xff] %v4223_v11  ;;  %1938 = vperm.xlu1 %3185, %v1557_v32   ;;  %v1560_v11 = vmul.f32 %v3935_v37, %v4226_v31  ;;  %v1565_v37 = vmul.f32 %v3949_v30, %v4226_v31  ;;  %v1569_v30 = vmul.f32 %v3959_v26, %v4226_v31 }
 0x2cb   :  { %v1573_v26 = vmul.f32 %v3969_v51, %v4226_v31  ;;  %v1577_v51 = vmul.f32 %v3979_v28, %v4226_v31  ;;  %v1578_v15 = vmul.f32 %v4057_v56, %v4226_v31  ;;  %v1581_v28 = vmul.f32 %v3997_v58, %v4226_v31 }
 0x2cc   :  { %1935 = vperm.xlu0 %3184, %v1556_v60   ;;  %v1580_v25 = vmul.f32 %v4065_v53, %v4226_v31  ;;  %v1583_v4 = vmul.f32 %v4007_v13, %v4226_v31  ;;  %v1582_v56 = vmul.f32 %v4071_v10, %v4226_v31  ;;  %v1585_v58 = vmul.f32 %v4017_v22, %v4226_v31 }
 0x2cd   :  { %v4234_v7 = vpop.permute.xlu1 %1758  ;;  %v1584_v53 = vmul.f32 %v4079_v16, %v4226_v31  ;;  %v1587_v13 = vmul.f32 %v4029_v21, %v4226_v31  ;;  %v1586_v10 = vmul.f32 %v4087_v18, %v4226_v31  ;;  %v1589_v22 = vmul.f32 %v4039_v1, %v4226_v31 }
 0x2ce   :  { %1944 = vperm.xlu1 %3185, %v1559_v36   ;;  %v1588_v16 = vmul.f32 %v4093_v62, %v4226_v31  ;;  %v1591_v21 = vmul.f32 %v4051_v50, %v4226_v31  ;;  %v1590_v18 = vmul.f32 %v4101_v49, %v4226_v31  ;;  %v1599_v1 = vmul.f32 %v4095_v33, %v4226_v31 }
 0x2cf   :  { %v4236_v2 = vpop.permute.xlu0 %1755  ;;  %v1592_v62 = vmul.f32 %v4109_v57, %v4226_v31  ;;  %v1607_v50 = vmul.f32 %v4139_v14, %v4226_v31  ;;  %v1600_v49 = vmul.f32 %v4137_v29, %v4226_v31  ;;  %v1615_v33 = vmul.f32 %v4183_v45, %v4226_v31 }
 0x2d0   :  { %1941 = vperm.xlu0 %3184, %v1558_v24   ;;  %v1608_v57 = vmul.f32 %v4167_v59, %v4226_v31  ;;  %v1593_v29 = vmul.f32 %v4061_v3, %v4226_v31  ;;  %v1616_v14 = vmul.f32 %v4197_v23, %v4226_v31  ;;  %v1609_v59 = vmul.f32 %v4149_v35, %v4226_v31 }
 0x2d1   :  { %v4242_v32 = vpop.permute.xlu1 %1764  ;;  %v1601_v45 = vmul.f32 %v4105_v39, %v4226_v31  ;;  %v1594_v3 = vmul.f32 %v4115_v0, %v4226_v31  ;;  %v1617_v23 = vmul.f32 %v4193_v48, %v4226_v31  ;;  %v1610_v39 = vmul.f32 %v4175_v42, %v4226_v31 }
 0x2d2   :  { %1950 = vperm.xlu1 %3185, %v1561_v20   ;;  %v1602_v35 = vmul.f32 %v4145_v54, %v4226_v31  ;;  %v1595_v48 = vmul.f32 %v4073_v63, %v4226_v31  ;;  %v1618_v0 = vmul.f32 %v4203_v34, %v4226_v31  ;;  %v1611_v54 = vmul.f32 %v4161_v17, %v4226_v31  ;;  %v4926_v34 = vld [vmem:[#allocation18_spill] sm:$0xff] }
 0x2d3   :  { %v4244_v60 = vpop.permute.xlu0 %1761  ;;  %v1603_v42 = vmul.f32 %v4117_v41, %v4226_v31  ;;  %v1596_v63 = vmul.f32 %v4123_v52, %v4226_v31  ;;  %v4928_v41 = vld [vmem:[#allocation16_spill] sm:$0xff]  ;;  %v4932_v52 = vld [vmem:[#allocation10_spill] sm:$0xff] }
 0x2d4   :  { %1947 = vperm.xlu0 %3184, %v1560_v11   ;;  %v1612_v17 = vmul.f32 %v4928_v41, %v4226_v31  ;;  %v4935_v41 = vld [vmem:[#allocation15_spill] sm:$0xff] }
 0x2d5   :  { %v4250_v36 = vpop.permute.xlu1 %1770 }
 0x2d6   :  { %1956 = vperm.xlu1 %3185, %v1563_v6  }
 0x2d7   :  { %v4252_v24 = vpop.permute.xlu0 %1767 }
 0x2d8   :  { %1953 = vperm.xlu0 %3184, %v1562_v38  }
 0x2d9   :  { %v4258_v20 = vpop.permute.xlu1 %1776 }
 0x2da   :  { %1962 = vperm.xlu1 %3185, %v1565_v37  }
 0x2db   :  { %v4260_v11 = vpop.permute.xlu0 %1773 }
 0x2dc   :  { %1959 = vperm.xlu0 %3184, %v1564_v55  }
 0x2dd   :  { %v4266_v6 = vpop.permute.xlu1 %1782 }
 0x2de   :  { %1968 = vperm.xlu1 %3185, %v1567_v44  }
 0x2df   :  { %v4268_v38 = vpop.permute.xlu0 %1779 }
 0x2e0   :  { %1965 = vperm.xlu0 %3184, %v1566_v40  }
 0x2e1   :  { %v4274_v37 = vpop.permute.xlu1 %1788 }
 0x2e2   :  { %1974 = vperm.xlu1 %3185, %v1569_v30  }
 0x2e3   :  { %v4276_v55 = vpop.permute.xlu0 %1785 }
 0x2e4   :  { %1971 = vperm.xlu0 %3184, %v1568_v43  }
 0x2e5   :  { %v4282_v44 = vpop.permute.xlu1 %1794 }
 0x2e6   :  { %1980 = vperm.xlu1 %3185, %v1571_v12  }
 0x2e7   :  { %v4284_v40 = vpop.permute.xlu0 %1791 }
 0x2e8   :  { %1977 = vperm.xlu0 %3184, %v1570_v46  }
 0x2e9   :  { %v4290_v30 = vpop.permute.xlu1 %1800 }
 0x2ea   :  { %1986 = vperm.xlu1 %3185, %v1573_v26  }
 0x2eb   :  { %v4292_v43 = vpop.permute.xlu0 %1797 }
 0x2ec   :  { %1983 = vperm.xlu0 %3184, %v1572_v47  }
 0x2ed   :  { %v4298_v12 = vpop.permute.xlu1 %1806 }
 0x2ee   :  { %1992 = vperm.xlu1 %3185, %v1575_v5  }
 0x2ef   :  { %v4300_v46 = vpop.permute.xlu0 %1803 }
 0x2f0   :  { %1989 = vperm.xlu0 %3184, %v1574_v61  }
 0x2f1   :  { %v4306_v26 = vpop.permute.xlu1 %1812 }
 0x2f2   :  { %1998 = vperm.xlu1 %3185, %v1577_v51  }
 0x2f3   :  { %v4308_v47 = vpop.permute.xlu0 %1809 }
 0x2f4   :  { %1995 = vperm.xlu0 %3184, %v1576_v8  }
 0x2f5   :  { %v4314_v5 = vpop.permute.xlu1 %1818 }
 0x2f6   :  { %2004 = vperm.xlu1 %3185, %v1579_v19  }
 0x2f7   :  { %v4316_v61 = vpop.permute.xlu0 %1815 }
 0x2f8   :  { %2001 = vperm.xlu0 %3184, %v1578_v15  }
 0x2f9   :  { %v4322_v51 = vpop.permute.xlu1 %1824 }
 0x2fa   :  { %2010 = vperm.xlu1 %3185, %v1581_v28  }
 0x2fb   :  { %v4324_v8 = vpop.permute.xlu0 %1821 }
 0x2fc   :  { %2007 = vperm.xlu0 %3184, %v1580_v25  }
 0x2fd   :  { %v4330_v19 = vpop.permute.xlu1 %1830 }
 0x2fe   :  { %2016 = vperm.xlu1 %3185, %v1583_v4  }
 0x2ff   :  { %v4332_v15 = vpop.permute.xlu0 %1827 }
 0x300   :  { %2013 = vperm.xlu0 %3184, %v1582_v56  }
 0x301   :  { %v4338_v28 = vpop.permute.xlu1 %1836 }
 0x302   :  { %2022 = vperm.xlu1 %3185, %v1585_v58  }
 0x303   :  { %v4340_v25 = vpop.permute.xlu0 %1833 }
 0x304   :  { %2019 = vperm.xlu0 %3184, %v1584_v53  }
 0x305   :  { %v4346_v4 = vpop.permute.xlu1 %1842 }
 0x306   :  { %2028 = vperm.xlu1 %3185, %v1587_v13  }
 0x307   :  { %v4348_v56 = vpop.permute.xlu0 %1839 }
 0x308   :  { %2025 = vperm.xlu0 %3184, %v1586_v10  }
 0x309   :  { %v4354_v58 = vpop.permute.xlu1 %1848 }
 0x30a   :  { %2034 = vperm.xlu1 %3185, %v1589_v22  }
 0x30b   :  { %v4356_v53 = vpop.permute.xlu0 %1845 }
 0x30c   :  { %2031 = vperm.xlu0 %3184, %v1588_v16  }
 0x30d   :  { %v4362_v13 = vpop.permute.xlu1 %1854 }
 0x30e   :  { %2040 = vperm.xlu1 %3185, %v1591_v21  }
 0x30f   :  { %v4364_v10 = vpop.permute.xlu0 %1851 }
 0x310   :  { %2037 = vperm.xlu0 %3184, %v1590_v18  }
 0x311   :  { %v4370_v22 = vpop.permute.xlu1 %1860 }
 0x312   :  { %2064 = vperm.xlu1 %3185, %v1599_v1  }
 0x313   :  { %v4372_v16 = vpop.permute.xlu0 %1857 }
 0x314   :  { %2043 = vperm.xlu0 %3184, %v1592_v62  }
 0x315   :  { %v4378_v21 = vpop.permute.xlu1 %1866 }
 0x316   :  { %2088 = vperm.xlu1 %3185, %v1607_v50  }
 0x317   :  { %v4380_v18 = vpop.permute.xlu0 %1863 }
 0x318   :  { %2067 = vperm.xlu0 %3184, %v1600_v49  }
 0x319   :  { %v4386_v1 = vpop.permute.xlu1 %1872 }
 0x31a   :  { %2112 = vperm.xlu1 %3185, %v1615_v33  }
 0x31b   :  { %v4388_v62 = vpop.permute.xlu0 %1869 }
 0x31c   :  { %4922 = vst [vmem:[#allocation21_spill] sm:$0xff] %v4388_v62  ;;  %2091 = vperm.xlu0 %3184, %v1608_v57  }
 0x31d   :  { %v4394_v50 = vpop.permute.xlu1 %1878 }
 0x31e   :  { %2046 = vperm.xlu1 %3185, %v1593_v29  }
 0x31f   :  { %v4396_v49 = vpop.permute.xlu0 %1875 }
 0x320   :  { %2115 = vperm.xlu0 %3184, %v1616_v14  }
 0x321   :  { %v4402_v33 = vpop.permute.xlu1 %1884 }
 0x322   :  { %2094 = vperm.xlu1 %3185, %v1609_v59  }
 0x323   :  { %v4404_v57 = vpop.permute.xlu0 %1881 }
 0x324   :  { %2070 = vperm.xlu0 %3184, %v1601_v45  }
 0x325   :  { %v4410_v29 = vpop.permute.xlu1 %1890 }
 0x326   :  { %4923 = vst [vmem:[#allocation22_spill] sm:$0xff] %v4410_v29  ;;  %2049 = vperm.xlu1 %3185, %v1594_v3  }
 0x327   :  { %v4412_v14 = vpop.permute.xlu0 %1887 }
 0x328   :  { %2118 = vperm.xlu0 %3184, %v1617_v23  }
 0x329   :  { %v4418_v59 = vpop.permute.xlu1 %1896 }
 0x32a   :  { %2097 = vperm.xlu1 %3185, %v1610_v39  }
 0x32b   :  { %v4420_v45 = vpop.permute.xlu0 %1893 }
 0x32c   :  { %4924 = vst [vmem:[#allocation23_spill] sm:$0xff] %v4420_v45  ;;  %2073 = vperm.xlu0 %3184, %v1602_v35  }
 0x32d   :  { %v4426_v3 = vpop.permute.xlu1 %1902 }
 0x32e   :  { %2052 = vperm.xlu1 %3185, %v1595_v48   ;;  %v1619_v48 = vmul.f32 %v4926_v34, %v4226_v31  ;;  %v1597_v34 = vmul.f32 %v4932_v52, %v4226_v31 }
 0x32f   :  { %v4428_v23 = vpop.permute.xlu0 %1899 }
 0x330   :  { %2121 = vperm.xlu0 %3184, %v1618_v0  }
 0x331   :  { %v4434_v39 = vpop.permute.xlu1 %1908 }
 0x332   :  { %4925 = vst [vmem:[#allocation24_spill] sm:$0xff] %v4434_v39  ;;  %2100 = vperm.xlu1 %3185, %v1611_v54   ;;  %v4929_v54 = vld [vmem:[#allocation13_spill] sm:$0xff] }
 0x333   :  { %v4436_v35 = vpop.permute.xlu0 %1905  ;;  %v1604_v45 = vmul.f32 %v4929_v54, %v4226_v31  ;;  %v1613_v54 = vmul.f32 %v4935_v41, %v4226_v31  ;;  %v4943_v41 = vld [vmem:[#allocation17_spill] sm:$0xff] }
 0x334   :  { %2076 = vperm.xlu0 %3184, %v1603_v42  }
 0x335   :  { %v4442_v29 = vpop.permute.xlu1 %1914 }
 0x336   :  { %4927 = vst [vmem:[#allocation18_spill] sm:$0xff] %v4442_v29  ;;  %2055 = vperm.xlu1 %3185, %v1596_v63   ;;  %v1620_v63 = vmul.f32 %v4213_v27, %v4226_v31  ;;  %v4939_v27 = vld [vmem:[#allocation12_spill] sm:$0xff] }
 0x337   :  { %v4444_v0 = vpop.permute.xlu0 %1911  ;;  %v1598_v52 = vmul.f32 %v4939_v27, %v4226_v31  ;;  %v4946_v27 = vld [vmem:[#allocation20_spill] sm:$0xff] }
 0x338   :  { %2124 = vperm.xlu0 %3184, %v1619_v48  }
 0x339   :  { %v4450_v39 = vpop.permute.xlu1 %1920 }
 0x33a   :  { %4930 = vst [vmem:[#allocation16_spill] sm:$0xff] %v4450_v39  ;;  %2103 = vperm.xlu1 %3185, %v1612_v17   ;;  %v4936_v17 = vld [vmem:[#allocation11_spill] sm:$0xff] }
 0x33b   :  { %v4452_v42 = vpop.permute.xlu0 %1917  ;;  %v1605_v39 = vmul.f32 %v4936_v17, %v4226_v31  ;;  %v1614_v17 = vmul.f32 %v4943_v41, %v4226_v31 }
 0x33c   :  { %4931 = vst [vmem:[#allocation13_spill] sm:$0xff] %v4452_v42  ;;  %2079 = vperm.xlu0 %3184, %v1604_v45  }
 0x33d   :  { %v4458_v29 = vpop.permute.xlu1 %1926 }
 0x33e   :  { %4933 = vst [vmem:[#allocation10_spill] sm:$0xff] %v4458_v29  ;;  %2058 = vperm.xlu1 %3185, %v1597_v34   ;;  %v4940_v34 = vld [vmem:[#allocation19_spill] sm:$0xff] }
 0x33f   :  { %v4460_v48 = vpop.permute.xlu0 %1923  ;;  %v1621_v29 = vmul.f32 %v4940_v34, %v4226_v31 }
 0x340   :  { %4934 = vst [vmem:[#allocation25_spill] sm:$0xff] %v4460_v48  ;;  %2127 = vperm.xlu0 %3184, %v1620_v63  }
 0x341   :  { %v4466_v42 = vpop.permute.xlu1 %1932 }
 0x342   :  { %4937 = vst [vmem:[#allocation15_spill] sm:$0xff] %v4466_v42  ;;  %2106 = vperm.xlu1 %3185, %v1613_v54   ;;  %v4944_v42 = vld [vmem:[#allocation9_spill] sm:$0xff] }
 0x343   :  { %v4468_v45 = vpop.permute.xlu0 %1929  ;;  %v2142_v54 = vrot.slane %v4236_v2, %v4944_v42  ;;  %v2138_v34 = vrot.slane %v4946_v27, %v4944_v42  ;;  %v1622_v2 = vmul.f32 %v4228_v9, %v4226_v31  ;;  %v2146_v41 = vrot.slane %v4234_v7, %v4944_v42 }
 0x344   :  { %4938 = vst [vmem:[#allocation11_spill] sm:$0xff] %v4468_v45  ;;  %2082 = vperm.xlu0 %3184, %v1605_v39   ;;  %v4945_v39 = vld [vmem:[#allocation14_spill] sm:$0xff]  ;;  %v2202_v27 = vrot.slane %v4290_v30, %v4944_v42 }
 0x345   :  { %v4474_v48 = vpop.permute.xlu1 %1938  ;;  %v1606_v45 = vmul.f32 %v4945_v39, %v4226_v31  ;;  %v2174_v39 = vrot.slane %v4268_v38, %v4944_v42  ;;  %v2158_v31 = vrot.slane %v4252_v24, %v4944_v42  ;;  %v2182_v38 = vrot.slane %v4276_v55, %v4944_v42 }
 0x346   :  { %4941 = vst [vmem:[#allocation12_spill] sm:$0xff] %v4474_v48  ;;  %2061 = vperm.xlu1 %3185, %v1598_v52   ;;  %v2150_v52 = vrot.slane %v4244_v60, %v4944_v42  ;;  %v2206_v60 = vrot.slane %v4300_v46, %v4944_v42  ;;  %v2178_v46 = vrot.slane %v4266_v6, %v4944_v42 }
 0x347   :  { %v4476_v63 = vpop.permute.xlu0 %1935 }
 0x348   :  { %4942 = vst [vmem:[#allocation19_spill] sm:$0xff] %v4476_v63  ;;  %2130 = vperm.xlu0 %3184, %v1621_v29   ;;  %v2647_v29 = vsel %vm955_vm7, %v2142_v54, %v2138_v34  ;;  %v2170_v54 = vrot.slane %v4258_v20, %v4944_v42  ;;  %v2154_v20 = vrot.slane %v4242_v32, %v4944_v42 }
 0x349   :  { %v4484_v62 = vpop.permute.xlu1 %1944  ;;  %v2665_v24 = vsel %vm955_vm7, %v2206_v60, %v2202_v27  ;;  %v2238_v32 = vrot.slane %v4332_v15, %v4944_v42  ;;  %v2234_v15 = vrot.slane %v4322_v51, %v4944_v42  ;;  %v2246_v51 = vrot.slane %v4340_v25, %v4944_v42 }
 0x34a   :  { %2109 = vperm.xlu1 %3185, %v1614_v17   ;;  %v2658_v7 = vsel %vm955_vm7, %v2174_v39, %v2170_v54  ;;  %v2190_v39 = vrot.slane %v4284_v40, %v4944_v42  ;;  %v2186_v54 = vrot.slane %v4274_v37, %v4944_v42  ;;  %v2218_v37 = vrot.slane %v4306_v26, %v4944_v42 }
 0x34b   :  { %v4488_v48 = vpop.permute.xlu0 %1941  ;;  %v2659_v30 = vsel %vm957_vm8, %v2178_v46, %v2658_v7  ;;  %v2672_v7 = vsel %vm955_vm7, %v2238_v32, %v2234_v15  ;;  %v2270_v27 = vrot.slane %v4364_v10, %v4944_v42  ;;  %v2194_v26 = vrot.slane %v4282_v44, %v4944_v42 }
 0x34c   :  { %2085 = vperm.xlu0 %3184, %v1606_v45   ;;  %v2648_v45 = vsel %vm957_vm8, %v2146_v41, %v2647_v29  ;;  %v2660_v41 = vsel %vm959_vm9, %v2182_v38, %v2659_v30  ;;  %v2198_v46 = vrot.slane %v4292_v43, %v4944_v42  ;;  %v2230_v10 = vrot.slane %v4324_v8, %v4944_v42 }
 0x34d   :  { %v4499_v63 = vpop.permute.xlu1 %1950  ;;  %v2649_v9 = vsel %vm959_vm9, %v2150_v52, %v2648_v45  ;;  %v2214_v52 = vrot.slane %v4308_v47, %v4944_v42  ;;  %v2166_v47 = vrot.slane %v4260_v11, %v4944_v42  ;;  %v2661_v11 = vsel %vm2650_vm11, %v2186_v54, %v2660_v41 }
 0x34e   :  { %v2651_v55 = vsel %vm2650_vm11, %v2154_v20, %v2649_v9  ;;  %v2162_v9 = vrot.slane %v4250_v36, %v4944_v42  ;;  %v2662_v38 = vsel %vm2652_vm12, %v2190_v39, %v2661_v11  ;;  %v2242_v36 = vrot.slane %v4330_v19, %v4944_v42 }
 0x34f   :  { %v4501_v17 = vpop.permute.xlu0 %1947  ;;  %v2653_v6 = vsel %vm2652_vm12, %v2158_v31, %v2651_v55  ;;  %v2222_v31 = vrot.slane %v4316_v61, %v4944_v42  ;;  %v2266_v30 = vrot.slane %v4354_v58, %v4944_v42  ;;  %v2226_v44 = vrot.slane %v4314_v5, %v4944_v42 }
 0x350   :  { %2133 = vperm.xlu0 %3184, %v1622_v2   ;;  %v2210_v2 = vrot.slane %v4298_v12, %v4944_v42  ;;  %v2655_v20 = vsel %vm2654_vm13, %v2162_v9, %v2653_v6  ;;  %v2673_v55 = vsel %vm957_vm8, %v2242_v36, %v2672_v7  ;;  %v2663_v32 = vsel %vm2654_vm13, %v2194_v26, %v2662_v38 }
 0x351   :  { %v4516_v34 = vpop.permute.xlu1 %1956  ;;  %v2674_v43 = vsel %vm959_vm9, %v2246_v51, %v2673_v55  ;;  %v2250_v6 = vrot.slane %v4338_v28, %v4944_v42  ;;  %v2254_v8 = vrot.slane %v4348_v56, %v4944_v42  ;;  %v2679_v41 = vsel %vm955_vm7, %v2270_v27, %v2266_v30 }
 0x352   :  { %v2666_v12 = vsel %vm957_vm8, %v2210_v2, %v2665_v24  ;;  %v2302_v2 = vrot.slane %v4396_v49, %v4944_v42  ;;  %v2278_v58 = vrot.slane %v4372_v16, %v4944_v42  ;;  %v2274_v5 = vrot.slane %v4362_v13, %v4944_v42 }
 0x353   :  { %v4522_v29 = vpop.permute.xlu0 %1953  ;;  %v2667_v40 = vsel %vm959_vm9, %v2214_v52, %v2666_v12  ;;  %v2657_v52 = vsel %vm2656_vm14, %v2166_v47, %v2655_v20  ;;  %v2298_v49 = vrot.slane %v4386_v1, %v4944_v42  ;;  %v2334_v47 = vrot.slane %v4428_v23, %v4944_v42 }
 0x354   :  { %v2668_v25 = vsel %vm2650_vm11, %v2218_v37, %v2667_v40  ;;  %v2675_v54 = vsel %vm2650_vm11, %v2250_v6, %v2674_v43  ;;  %v4607_v12 = vsel %vm2779_vm15, %v2657_v52, 0.0  ;;  %v2664_v16 = vsel %vm2656_vm14, %v2198_v46, %v2663_v32  ;;  %v4949_v6 = vld [vmem:[#allocation23_spill] sm:$0xff] }
 0x355   :  { %v4537_v45 = vpop.permute.xlu1 %1962  ;;  %v2669_v19 = vsel %vm2652_vm12, %v2222_v31, %v2668_v25  ;;  %v2680_v13 = vsel %vm957_vm8, %v2274_v5, %v2679_v41  ;;  %v2686_v1 = vsel %vm955_vm7, %v2302_v2, %v2298_v49  ;;  %v2310_v23 = vrot.slane %v4404_v57, %v4944_v42  ;;  %v4948_v2 = vld [vmem:[#allocation24_spill] sm:$0xff]  ;;  %v4951_v5 = vld [vmem:[#allocation22_spill] sm:$0xff] }
 0x356   :  { %v2670_v56 = vsel %vm2654_vm13, %v2226_v44, %v2669_v19  ;;  %v2330_v9 = vrot.slane %v4418_v59, %v4944_v42  ;;  %v2676_v40 = vsel %vm2652_vm12, %v2254_v8, %v2675_v54  ;;  %v2681_v31 = vsel %vm959_vm9, %v2278_v58, %v2680_v13 }
 0x357   :  { %v4546_v60 = vpop.permute.xlu0 %1959  ;;  %v2671_v15 = vsel %vm2656_vm14, %v2230_v10, %v2670_v56  ;;  %v2286_v11 = vrot.slane %v4380_v18, %v4944_v42  ;;  %v2306_v37 = vrot.slane %v4394_v50, %v4944_v42  ;;  %v2258_v51 = vrot.slane %v4346_v4, %v4944_v42 }
 0x358   :  { %v2282_v57 = vrot.slane %v4370_v22, %v4944_v42  ;;  %v2693_v59 = vsel %vm955_vm7, %v2334_v47, %v2330_v9  ;;  %v2342_v38 = vrot.slane %v4436_v35, %v4944_v42  ;;  %v2338_v50 = vrot.slane %v4426_v3, %v4944_v42 }
 0x359   :  { %v4564_v61 = vpop.permute.xlu1 %1968  ;;  %v2687_v18 = vsel %vm957_vm8, %v2306_v37, %v2686_v1  ;;  %v2783_v27 = vsel %vm2779_vm15, %v2664_v16, 0.0  ;;  %v4639_v20 = vsel %vm2779_vm15, %v2671_v15, 0.0  ;;  %v2318_v26 = vrot.slane %v4412_v14, %v4944_v42  ;;  %v4952_v15 = vld [vmem:[#allocation16_spill] sm:$0xff]  ;;  %v4953_v1 = vld [vmem:[#allocation13_spill] sm:$0xff] }
 0x35a   :  { %v2682_v4 = vsel %vm2650_vm11, %v2282_v57, %v2681_v31  ;;  %v2688_v22 = vsel %vm959_vm9, %v2310_v23, %v2687_v18  ;;  %v2677_v35 = vsel %vm2654_vm13, %v2258_v51, %v2676_v40  ;;  %v2314_v25 = vrot.slane %v4402_v33, %v4944_v42  ;;  %v4947_v33 = vld [vmem:[#allocation21_spill] sm:$0xff]  ;;  %v4954_v31 = vld [vmem:[#allocation18_spill] sm:$0xff] }
 0x35b   :  { %v4572_v24 = vpop.permute.xlu0 %1965  ;;  %v2683_v46 = vsel %vm2652_vm12, %v2286_v11, %v2682_v4  ;;  %v2694_v3 = vsel %vm957_vm8, %v2338_v50, %v2693_v59  ;;  %v2398_v52 = vrot.slane %v4501_v17, %v4944_v42  ;;  %v2262_v10 = vrot.slane %v4356_v53, %v4944_v42  ;;  %v4955_v59 = vld [vmem:[#allocation11_spill] sm:$0xff]  ;;  %v4956_v50 = vld [vmem:[#allocation10_spill] sm:$0xff] }
 0x35c   :  { %v2290_v14 = vrot.slane %v4378_v21, %v4944_v42  ;;  %v2695_v55 = vsel %vm959_vm9, %v2342_v38, %v2694_v3  ;;  %v2350_v30 = vrot.slane %v4444_v0, %v4944_v42  ;;  %v2294_v43 = vrot.slane %v4947_v33, %v4944_v42  ;;  %v4950_v0 = vld [vmem:[#allocation25_spill] sm:$0xff] }
 0x35d   :  { %v4594_v39 = vpop.permute.xlu1 %1974  ;;  %v2689_v17 = vsel %vm2650_vm11, %v2314_v25, %v2688_v22  ;;  %v2346_v32 = vrot.slane %v4948_v2, %v4944_v42  ;;  %v2394_v53 = vrot.slane %v4484_v62, %v4944_v42  ;;  %v2326_v8 = vrot.slane %v4949_v6, %v4944_v42 }
 0x35e   :  { %v2690_v21 = vsel %vm2652_vm12, %v2318_v26, %v2689_v17  ;;  %v2366_v41 = vrot.slane %v4950_v0, %v4944_v42  ;;  %v2684_v58 = vsel %vm2654_vm13, %v2290_v14, %v2683_v46  ;;  %v2322_v49 = vrot.slane %v4951_v5, %v4944_v42 }
 0x35f   :  { %v4602_v28 = vpop.permute.xlu0 %1971  ;;  %v2696_v47 = vsel %vm2650_vm11, %v2346_v32, %v2695_v55  ;;  %v2707_v56 = vsel %vm955_vm7, %v2398_v52, %v2394_v53  ;;  %v2406_v62 = vrot.slane %v4522_v29, %v4944_v42  ;;  %v2362_v13 = vrot.slane %v4952_v15, %v4944_v42  ;;  %v4957_v55 = vld [vmem:[#allocation15_spill] sm:$0xff] }
 0x360   :  { %v2697_v16 = vsel %vm2652_vm12, %v2350_v30, %v2696_v47  ;;  %v2358_v23 = vrot.slane %v4953_v1, %v4944_v42  ;;  %v2402_v9 = vrot.slane %v4499_v63, %v4944_v42  ;;  %v2354_v11 = vrot.slane %v4954_v31, %v4944_v42  ;;  %v4959_v47 = vld [vmem:[#allocation12_spill] sm:$0xff] }
 0x361   :  { %v4623_v7 = vpop.permute.xlu1 %1980  ;;  %v2685_v37 = vsel %vm2656_vm14, %v2294_v43, %v2684_v58  ;;  %v2678_v29 = vsel %vm2656_vm14, %v2262_v10, %v2677_v35  ;;  %v2691_v51 = vsel %vm2654_vm13, %v2322_v49, %v2690_v21  ;;  %v2700_v57 = vsel %vm955_vm7, %v2366_v41, %v2362_v13 }
 0x362   :  { %v2374_v38 = vrot.slane %v4955_v59, %v4944_v42  ;;  %v2708_v18 = vsel %vm957_vm8, %v2402_v9, %v2707_v56  ;;  %v2692_v63 = vsel %vm2656_vm14, %v2326_v8, %v2691_v51  ;;  %v2370_v4 = vrot.slane %v4956_v50, %v4944_v42 }
 0x363   :  { %v4632_v36 = vpop.permute.xlu0 %1977  ;;  %v2709_v22 = vsel %vm959_vm9, %v2406_v62, %v2708_v18  ;;  %v2414_v26 = vrot.slane %v4546_v60, %v4944_v42  ;;  %v2698_v46 = vsel %vm2654_vm13, %v2354_v11, %v2697_v16  ;;  %v2410_v25 = vrot.slane %v4516_v34, %v4944_v42 }
 0x364   :  { %v2430_v3 = vrot.slane %v4602_v28, %v4944_v42  ;;  %v2792_v10 = vsel %vm2779_vm15, %v2685_v37, 0.0  ;;  %v2699_v14 = vsel %vm2656_vm14, %v2358_v23, %v2698_v46  ;;  %v2378_v60 = vrot.slane %v4957_v55, %v4944_v42  ;;  %v4958_v28 = vld [vmem:[#allocation19_spill] sm:$0xff] }
 0x365   :  { %v4652_v19 = vpop.permute.xlu1 %1986  ;;  %v2701_v30 = vsel %vm957_vm8, %v2370_v4, %v2700_v57  ;;  %v2426_v17 = vrot.slane %v4564_v61, %v4944_v42  ;;  %v2418_v2 = vrot.slane %v4537_v45, %v4944_v42  ;;  %v2422_v53 = vrot.slane %v4572_v24, %v4944_v42 }
 0x366   :  { %v2702_v43 = vsel %vm959_vm9, %v2374_v38, %v2701_v30  ;;  %v2438_v0 = vrot.slane %v4632_v36, %v4944_v42  ;;  %v2789_v45 = vsel %vm2779_vm15, %v2678_v29, 0.0  ;;  %v2434_v24 = vrot.slane %v4594_v39, %v4944_v42 }
 0x367   :  { %v4661_v44 = vpop.permute.xlu0 %1983  ;;  %v2714_v8 = vsel %vm955_vm7, %v2430_v3, %v2426_v17  ;;  %v2703_v58 = vsel %vm2650_vm11, %v2378_v60, %v2702_v43  ;;  %v2798_v49 = vsel %vm2779_vm15, %v2699_v14, 0.0  ;;  %v2386_v36 = vrot.slane %v4959_v47, %v4944_v42 }
 0x368   :  { %v2715_v16 = vsel %vm957_vm8, %v2434_v24, %v2714_v8  ;;  %v2446_v23 = vrot.slane %v4661_v44, %v4944_v42  ;;  %v2795_v29 = vsel %vm2779_vm15, %v2692_v63, 0.0 }
 0x369   :  { %v1993_v54 = vpop.permute.xlu1 %1992  ;;  %v2716_v1 = vsel %vm959_vm9, %v2438_v0, %v2715_v16 }
 0x36a   :  { %v2458_v33 = vrot.slane %v1993_v54, %v4944_v42  ;;  %v2390_v54 = vrot.slane %v4488_v48, %v4944_v42  ;;  %v2442_v48 = vrot.slane %v4623_v7, %v4944_v42 }
 0x36b   :  { %v4689_v40 = vpop.permute.xlu0 %1989 }
 0x36c   :  { %v2717_v57 = vsel %vm2650_vm11, %v2442_v48, %v2716_v1  ;;  %v2454_v7 = vrot.slane %v4689_v40, %v4944_v42 }
 0x36d   :  { %v1999_v35 = vpop.permute.xlu1 %1998  ;;  %v2718_v50 = vsel %vm2652_vm12, %v2446_v23, %v2717_v57 }
 0x36e   :  { %2781 = vadd.xlane.f32.xlu1 %v4607_v12  ;;  %v2382_v12 = vrot.slane %v4958_v28, %v4944_v42  ;;  %v2466_v41 = vrot.slane %v1999_v35, %v4944_v42 }
 0x36f   :  { %2784 = vadd.xlane.f32.xlu0 %v2783_v27  ;;  %v1996_v52 = vpop.permute.xlu0 %1995  ;;  %v2710_v27 = vsel %vm2650_vm11, %v2410_v25, %v2709_v22  ;;  %v2450_v22 = vrot.slane %v4652_v19, %v4944_v42 }
 0x370   :  { %v2462_v34 = vrot.slane %v1996_v52, %v4944_v42  ;;  %v2711_v32 = vsel %vm2652_vm12, %v2414_v26, %v2710_v27  ;;  %v2704_v56 = vsel %vm2652_vm12, %v2382_v12, %v2703_v58 }
 0x371   :  { %v2005_v6 = vpop.permute.xlu1 %2004  ;;  %v2705_v51 = vsel %vm2654_vm13, %v2386_v36, %v2704_v56  ;;  %v2719_v52 = vsel %vm2654_vm13, %v2450_v22, %v2718_v50 }
 0x372   :  { %v2721_v21 = vsel %vm955_vm7, %v2462_v34, %v2458_v33  ;;  %2793 = vadd.xlane.f32.xlu1 %v2792_v10  ;;  %v2474_v9 = vrot.slane %v2005_v6, %v4944_v42  ;;  %v2706_v18 = vsel %vm2656_vm14, %v2390_v54, %v2705_v51  ;;  %v2720_v14 = vsel %vm2656_vm14, %v2454_v7, %v2719_v52 }
 0x373   :  { %2787 = vadd.xlane.f32.xlu0 %v4639_v20  ;;  %v2002_v61 = vpop.permute.xlu0 %2001  ;;  %v2722_v62 = vsel %vm957_vm8, %v2466_v41, %v2721_v21  ;;  %v2712_v20 = vsel %vm2654_vm13, %v2418_v2, %v2711_v32  ;;  %v2801_v25 = vsel %vm2779_vm15, %v2706_v18, 0.0  ;;  %v2807_v33 = vsel %vm2779_vm15, %v2720_v14, 0.0 }
 0x374   :  { %v2470_v5 = vrot.slane %v2002_v61, %v4944_v42  ;;  %v2713_v13 = vsel %vm2656_vm14, %v2422_v53, %v2712_v20 }
 0x375   :  { %v2011_v15 = vpop.permute.xlu1 %2010  ;;  %v2804_v38 = vsel %vm2779_vm15, %v2713_v13, 0.0 }
 0x376   :  { %v2723_v39 = vsel %vm959_vm9, %v2470_v5, %v2722_v62  ;;  %2799 = vadd.xlane.f32.xlu1 %v2798_v49  ;;  %v2482_v4 = vrot.slane %v2011_v15, %v4944_v42 }
 0x377   :  { %2790 = vadd.xlane.f32.xlu0 %v2789_v45  ;;  %v2008_v31 = vpop.permute.xlu0 %2007  ;;  %v2724_v37 = vsel %vm2650_vm11, %v2474_v9, %v2723_v39 }
 0x378   :  { %v2478_v11 = vrot.slane %v2008_v31, %v4944_v42 }
 0x379   :  { %v2017_v59 = vpop.permute.xlu1 %2016 }
 0x37a   :  { %v2725_v44 = vsel %vm2652_vm12, %v2478_v11, %v2724_v37  ;;  %2805 = vadd.xlane.f32.xlu1 %v2804_v38  ;;  %v2490_v55 = vrot.slane %v2017_v59, %v4944_v42 }
 0x37b   :  { %2796 = vadd.xlane.f32.xlu0 %v2795_v29  ;;  %v2014_v63 = vpop.permute.xlu0 %2013  ;;  %v2726_v35 = vsel %vm2654_vm13, %v2482_v4, %v2725_v44 }
 0x37c   :  { %v2486_v26 = vrot.slane %v2014_v63, %v4944_v42 }
 0x37d   :  { %v2023_v46 = vpop.permute.xlu1 %2022 }
 0x37e   :  { %v2727_v3 = vsel %vm2656_vm14, %v2486_v26, %v2726_v35  ;;  %v2498_v34 = vrot.slane %v2023_v46, %v4944_v42 }
 0x37f   :  { %2802 = vadd.xlane.f32.xlu0 %v2801_v25  ;;  %v2020_v40 = vpop.permute.xlu0 %2019  ;;  %v2810_v10 = vsel %vm2779_vm15, %v2727_v3, 0.0 }
 0x380   :  { %v2494_v19 = vrot.slane %v2020_v40, %v4944_v42  ;;  %2811 = vadd.xlane.f32.xlu1 %v2810_v10 }
 0x381   :  { %v2029_v30 = vpop.permute.xlu1 %2028 }
 0x382   :  { %v2728_v60 = vsel %vm955_vm7, %v2494_v19, %v2490_v55  ;;  %v2506_v2 = vrot.slane %v2029_v30, %v4944_v42 }
 0x383   :  { %2808 = vadd.xlane.f32.xlu0 %v2807_v33  ;;  %v2026_v43 = vpop.permute.xlu0 %2025  ;;  %v2729_v12 = vsel %vm957_vm8, %v2498_v34, %v2728_v60 }
 0x384   :  { %v2502_v28 = vrot.slane %v2026_v43, %v4944_v42 }
 0x385   :  { %v2035_v17 = vpop.permute.xlu1 %2034 }
 0x386   :  { %v2730_v27 = vsel %vm959_vm9, %v2502_v28, %v2729_v12  ;;  %v2514_v0 = vrot.slane %v2035_v17, %v4944_v42 }
 0x387   :  { %v2032_v32 = vpop.permute.xlu0 %2031  ;;  %v2731_v21 = vsel %vm2650_vm11, %v2506_v2, %v2730_v27 }
 0x388   :  { %v2510_v53 = vrot.slane %v2032_v32, %v4944_v42 }
 0x389   :  { %v2041_v8 = vpop.permute.xlu1 %2040 }
 0x38a   :  { %v2732_v6 = vsel %vm2652_vm12, %v2510_v53, %v2731_v21  ;;  %v2522_v7 = vrot.slane %v2041_v8, %v4944_v42 }
 0x38b   :  { %v2038_v41 = vpop.permute.xlu0 %2037  ;;  %v2733_v45 = vsel %vm2654_vm13, %v2514_v0, %v2732_v6 }
 0x38c   :  { %v2518_v61 = vrot.slane %v2038_v41, %v4944_v42 }
 0x38d   :  { %v2065_v58 = vpop.permute.xlu1 %2064 }
 0x38e   :  { %v2734_v24 = vsel %vm2656_vm14, %v2518_v61, %v2733_v45  ;;  %v2554_v26 = vrot.slane %v2065_v58, %v4944_v42 }
 0x38f   :  { %v2044_v5 = vpop.permute.xlu0 %2043  ;;  %v2813_v49 = vsel %vm2779_vm15, %v2734_v24, 0.0 }
 0x390   :  { %2814 = vadd.xlane.f32.xlu0 %v2813_v49  ;;  %v2526_v59 = vrot.slane %v2044_v5, %v4944_v42 }
 0x391   :  { %v2089_v47 = vpop.permute.xlu1 %2088 }
 0x392   :  { %v2735_v3 = vsel %vm955_vm7, %v2526_v59, %v2522_v7  ;;  %v2586_v52 = vrot.slane %v2089_v47, %v4944_v42 }
 0x393   :  { %v2068_v36 = vpop.permute.xlu0 %2067 }
 0x394   :  { %v2558_v18 = vrot.slane %v2068_v36, %v4944_v42 }
 0x395   :  { %v2113_v56 = vpop.permute.xlu1 %2112 }
 0x396   :  { %v2618_v40 = vrot.slane %v2113_v56, %v4944_v42  ;;  %v2742_v55 = vsel %vm955_vm7, %v2558_v18, %v2554_v26 }
 0x397   :  { %v2092_v62 = vpop.permute.xlu0 %2091 }
 0x398   :  { %v2590_v4 = vrot.slane %v2092_v62, %v4944_v42 }
 0x399   :  { %v2047_v20 = vpop.permute.xlu1 %2046 }
 0x39a   :  { %v2530_v50 = vrot.slane %v2047_v20, %v4944_v42  ;;  %v2749_v33 = vsel %vm955_vm7, %v2590_v4, %v2586_v52 }
 0x39b   :  { %v2116_v54 = vpop.permute.xlu0 %2115 }
 0x39c   :  { %v2622_v63 = vrot.slane %v2116_v54, %v4944_v42  ;;  %v2736_v19 = vsel %vm957_vm8, %v2530_v50, %v2735_v3 }
 0x39d   :  { %v2095_v16 = vpop.permute.xlu1 %2094 }
 0x39e   :  { %v2594_v35 = vrot.slane %v2095_v16, %v4944_v42  ;;  %v2756_v34 = vsel %vm955_vm7, %v2622_v63, %v2618_v40 }
 0x39f   :  { %v2071_v39 = vpop.permute.xlu0 %2070 }
 0x3a0   :  { %v2562_v60 = vrot.slane %v2071_v39, %v4944_v42  ;;  %v2750_v12 = vsel %vm957_vm8, %v2594_v35, %v2749_v33 }
 0x3a1   :  { %v2050_v15 = vpop.permute.xlu1 %2049 }
 0x3a2   :  { %v2534_v22 = vrot.slane %v2050_v15, %v4944_v42  ;;  %v2743_v41 = vsel %vm957_vm8, %v2562_v60, %v2742_v55 }
 0x3a3   :  { %v4796_v13 = vpop.permute.xlu0 %2118 }
 0x3a4   :  { %v2737_v43 = vsel %vm959_vm9, %v2534_v22, %v2736_v19  ;;  %v2626_v24 = vrot.slane %v4796_v13, %v4944_v42 }
 0x3a5   :  { %v2098_v1 = vpop.permute.xlu1 %2097 }
 0x3a6   :  { %v2598_v28 = vrot.slane %v2098_v1, %v4944_v42 }
 0x3a7   :  { %v2074_v23 = vpop.permute.xlu0 %2073 }
 0x3a8   :  { %v2566_v27 = vrot.slane %v2074_v23, %v4944_v42  ;;  %v2751_v5 = vsel %vm959_vm9, %v2598_v28, %v2750_v12 }
 0x3a9   :  { %v2053_v9 = vpop.permute.xlu1 %2052 }
 0x3aa   :  { %v2538_v46 = vrot.slane %v2053_v9, %v4944_v42  ;;  %v2744_v36 = vsel %vm959_vm9, %v2566_v27, %v2743_v41 }
 0x3ab   :  { %v4798_v31 = vpop.permute.xlu0 %2121 }
 0x3ac   :  { %v2738_v17 = vsel %vm2650_vm11, %v2538_v46, %v2737_v43  ;;  %v2630_v56 = vrot.slane %v4798_v31, %v4944_v42 }
 0x3ad   :  { %v2101_v48 = vpop.permute.xlu1 %2100 }
 0x3ae   :  { %v2602_v2 = vrot.slane %v2101_v48, %v4944_v42 }
 0x3af   :  { %v2077_v11 = vpop.permute.xlu0 %2076 }
 0x3b0   :  { %v2570_v53 = vrot.slane %v2077_v11, %v4944_v42  ;;  %v2752_v62 = vsel %vm2650_vm11, %v2602_v2, %v2751_v5  ;;  %v2757_v11 = vsel %vm957_vm8, %v2626_v24, %v2756_v34 }
 0x3b1   :  { %v2056_v37 = vpop.permute.xlu1 %2055 }
 0x3b2   :  { %v2542_v10 = vrot.slane %v2056_v37, %v4944_v42  ;;  %v2745_v16 = vsel %vm2650_vm11, %v2570_v53, %v2744_v36 }
 0x3b3   :  { %v4800_v29 = vpop.permute.xlu0 %2124 }
 0x3b4   :  { %v2739_v21 = vsel %vm2652_vm12, %v2542_v10, %v2738_v17  ;;  %v2634_v39 = vrot.slane %v4800_v29, %v4944_v42 }
 0x3b5   :  { %v2104_v51 = vpop.permute.xlu1 %2103 }
 0x3b6   :  { %v2606_v6 = vrot.slane %v2104_v51, %v4944_v42 }
 0x3b7   :  { %v2080_v57 = vpop.permute.xlu0 %2079 }
 0x3b8   :  { %v2574_v61 = vrot.slane %v2080_v57, %v4944_v42  ;;  %v2753_v15 = vsel %vm2652_vm12, %v2606_v6, %v2752_v62  ;;  %v2758_v57 = vsel %vm959_vm9, %v2630_v56, %v2757_v11 }
 0x3b9   :  { %v2059_v44 = vpop.permute.xlu1 %2058 }
 0x3ba   :  { %v2546_v30 = vrot.slane %v2059_v44, %v4944_v42  ;;  %v2746_v23 = vsel %vm2652_vm12, %v2574_v61, %v2745_v16 }
 0x3bb   :  { %v4803_v38 = vpop.permute.xlu0 %2127 }
 0x3bc   :  { %v2740_v58 = vsel %vm2654_vm13, %v2546_v30, %v2739_v21  ;;  %v2638_v9 = vrot.slane %v4803_v38, %v4944_v42  ;;  %v2759_v38 = vsel %vm2650_vm11, %v2634_v39, %v2758_v57 }
 0x3bd   :  { %v2107_v25 = vpop.permute.xlu1 %2106 }
 0x3be   :  { %v2610_v45 = vrot.slane %v2107_v25, %v4944_v42  ;;  %v2760_v7 = vsel %vm2652_vm12, %v2638_v9, %v2759_v38 }
 0x3bf   :  { %v2083_v14 = vpop.permute.xlu0 %2082 }
 0x3c0   :  { %v2578_v49 = vrot.slane %v2083_v14, %v4944_v42  ;;  %v2754_v48 = vsel %vm2654_vm13, %v2610_v45, %v2753_v15 }
 0x3c1   :  { %v2062_v32 = vpop.permute.xlu1 %2061 }
 0x3c2   :  { %v2550_v8 = vrot.slane %v2062_v32, %v4944_v42  ;;  %v2747_v51 = vsel %vm2654_vm13, %v2578_v49, %v2746_v23 }
 0x3c3   :  { %v2131_v0 = vpop.permute.xlu0 %2130 }
 0x3c4   :  { %v2741_v47 = vsel %vm2656_vm14, %v2550_v8, %v2740_v58  ;;  %v2642_v37 = vrot.slane %v2131_v0, %v4944_v42 }
 0x3c5   :  { %v2110_v20 = vpop.permute.xlu1 %2109  ;;  %v2816_v54 = vsel %vm2779_vm15, %v2741_v47, 0.0 }
 0x3c6   :  { %v2614_v13 = vrot.slane %v2110_v20, %v4944_v42  ;;  %2817 = vadd.xlane.f32.xlu1 %v2816_v54  ;;  %v2761_v63 = vsel %vm2654_vm13, %v2642_v37, %v2760_v7 }
 0x3c7   :  { %v2086_v1 = vpop.permute.xlu0 %2085 }
 0x3c8   :  { %v2582_v31 = vrot.slane %v2086_v1, %v4944_v42  ;;  %v2755_v29 = vsel %vm2656_vm14, %v2614_v13, %v2754_v48 }
 0x3c9   :  { %v2822_v44 = vsel %vm2779_vm15, %v2755_v29, 0.0 }
 0x3ca   :  { %v2748_v59 = vsel %vm2656_vm14, %v2582_v31, %v2747_v51  ;;  %2823 = vadd.xlane.f32.xlu1 %v2822_v44 }
 0x3cb   :  { %v2134_v18 = vpop.permute.xlu0 %2133  ;;  %v2819_v50 = vsel %vm2779_vm15, %v2748_v59, 0.0 }
 0x3cc   :  { %v2646_v4 = vrot.slane %v2134_v18, %v4944_v42  ;;  %2820 = vadd.xlane.f32.xlu0 %v2819_v50 }
 0x3ce   :  { %v2762_v22 = vsel %vm2656_vm14, %v2646_v4, %v2761_v63 }
 0x3cf   :  { %v2825_v26 = vsel %vm2779_vm15, %v2762_v22, 0.0 }
 0x3d0   :  { %2826 = vadd.xlane.f32.xlu0 %v2825_v26 }
 0x3f7   :  { %v2782_v35 = vpop.xlane.xlu1 %2781 }
 0x3f8   :  { %v2785_v46 = vpop.xlane.xlu0 %2784  ;;  %v3163_v25 = vmul.f32 -1.442695, %v2782_v35 }
 0x3f9   :  { %v3164_v3 = vmul.f32 -1.442695, %v2785_v46 }
 0x3fa   :  { %3186 = vpow2.f32 %v3163_v25 }
 0x3fb   :  { %3188 = vpow2.f32 %v3164_v3  ;;  %v2794_v52 = vpop.xlane.xlu1 %2793 }
 0x3fc   :  { %v2788_v40 = vpop.xlane.xlu0 %2787  ;;  %v3167_v10 = vmul.f32 -1.442695, %v2794_v52 }
 0x3fd   :  { %v3165_v14 = vmul.f32 -1.442695, %v2788_v40 }
 0x3fe   :  { %3190 = vpow2.f32 %v3167_v10 }
 0x3ff   :  { %3192 = vpow2.f32 %v3165_v14  ;;  %v2800_v42 = vpop.xlane.xlu1 %2799 }
 0x400   :  { %v2791_v55 = vpop.xlane.xlu0 %2790  ;;  %v3169_v19 = vmul.f32 -1.442695, %v2800_v42 }
 0x401   :  { %v3166_v60 = vmul.f32 -1.442695, %v2791_v55 }
 0x402   :  { %3194 = vpow2.f32 %v3169_v19 }
 0x403   :  { %3196 = vpow2.f32 %v3166_v60  ;;  %v2806_v30 = vpop.xlane.xlu1 %2805 }
 0x404   :  { %v2797_v33 = vpop.xlane.xlu0 %2796  ;;  %v3171_v34 = vmul.f32 -1.442695, %v2806_v30 }
 0x405   :  { %v3168_v43 = vmul.f32 -1.442695, %v2797_v33 }
 0x406   :  { %3198 = vpow2.f32 %v3171_v34 }
 0x407   :  { %v3187_v28 = vpop.eup %3186  ;;  %3200 = vpow2.f32 %v3168_v43 }
 0x408   :  { %v2803_v12 = vpop.xlane.xlu0 %2802  ;;  %v3189_v27 = vpop.eup %3188  ;;  %v2876_v17 = vadd.f32 1.0, %v3187_v28 }
 0x409   :  { %v3170_v2 = vmul.f32 -1.442695, %v2803_v12  ;;  %v2812_v32 = vpop.xlane.xlu1 %2811  ;;  %v2877_v53 = vadd.f32 1.0, %v3189_v27 }
 0x40a   :  { %v3173_v21 = vmul.f32 -1.442695, %v2812_v32  ;;  %3202 = vrcp.f32 %v2876_v17 }
 0x40b   :  { %v3191_v6 = vpop.eup %3190  ;;  %3204 = vrcp.f32 %v2877_v53 }
 0x40c   :  { %v2809_v8 = vpop.xlane.xlu0 %2808  ;;  %v3193_v0 = vpop.eup %3192  ;;  %v2880_v41 = vadd.f32 1.0, %v3191_v6  ;;  %3206 = vpow2.f32 %v3170_v2 }
 0x40d   :  { %v3172_v61 = vmul.f32 -1.442695, %v2809_v8  ;;  %v2878_v45 = vadd.f32 1.0, %v3193_v0  ;;  %3208 = vpow2.f32 %v3173_v21 }
 0x40e   :  { %3210 = vrcp.f32 %v2880_v41 }
 0x40f   :  { %v3195_v58 = vpop.eup %3194  ;;  %3212 = vrcp.f32 %v2878_v45 }
 0x410   :  { %v3197_v24 = vpop.eup %3196  ;;  %v2882_v5 = vadd.f32 1.0, %v3195_v58  ;;  %3214 = vpow2.f32 %v3172_v61 }
 0x411   :  { %v2879_v49 = vadd.f32 1.0, %v3197_v24 }
 0x412   :  { %3216 = vrcp.f32 %v2882_v5  ;;  %v2944_v5 = vld [vmem:[#allocation3] sm:$0xff] }
 0x413   :  { %v3199_v47 = vpop.eup %3198  ;;  %3218 = vrcp.f32 %v2879_v49  ;;  %v2945_v49 = vld [vmem:[#allocation3 + $0x8] sm:$0xff] }
 0x414   :  { %v3201_v36 = vpop.eup %3200  ;;  %v2884_v56 = vadd.f32 1.0, %v3199_v47  ;;  %v2946_v47 = vld [vmem:[#allocation3 + $0x10] sm:$0xff] }
 0x415   :  { %v2881_v62 = vadd.f32 1.0, %v3201_v36  ;;  %v2947_v36 = vld [vmem:[#allocation3 + $0x18] sm:$0xff] }
 0x416   :  { %3220 = vrcp.f32 %v2884_v56 }
 0x417   :  { %v3203_v20 = vpop.eup %3202  ;;  %3222 = vrcp.f32 %v2881_v62 }
 0x418   :  { %v3205_v54 = vpop.eup %3204  ;;  %2925 = vst.msk [vmem:[#allocation2] sm:$0xff] %vm2924_vm0, %v3203_v20 }
 0x419   :  { %v2815_v16 = vpop.xlane.xlu0 %2814  ;;  %v3207_v39 = vpop.eup %3206  ;;  %2926 = vst.msk [vmem:[#allocation2 + $0x8] sm:$0xff] %vm2924_vm0, %v3205_v54 }
 0x41a   :  { %v3174_v15 = vmul.f32 -1.442695, %v2815_v16  ;;  %v3209_v13 = vpop.eup %3208  ;;  %v2883_v1 = vadd.f32 1.0, %v3207_v39 }
 0x41b   :  { %v3211_v23 = vpop.eup %3210  ;;  %v2886_v9 = vadd.f32 1.0, %v3209_v13  ;;  %v2949_v13 = vld [vmem:[#allocation3 + $0x28] sm:$0xff] }
 0x41c   :  { %3224 = vpow2.f32 %v3174_v15  ;;  %v3213_v31 = vpop.eup %3212  ;;  %2929 = vst.msk [vmem:[#allocation2 + $0x20] sm:$0xff] %vm2924_vm0, %v3211_v23  ;;  %v2948_v15 = vld [vmem:[#allocation3 + $0x20] sm:$0xff] }
 0x41d   :  { %3226 = vrcp.f32 %v2883_v1  ;;  %v3215_v48 = vpop.eup %3214  ;;  %2927 = vst.msk [vmem:[#allocation2 + $0x10] sm:$0xff] %vm2924_vm0, %v3213_v31  ;;  %v2950_v31 = vld [vmem:[#allocation3 + $0x30] sm:$0xff] }
 0x41e   :  { %3228 = vrcp.f32 %v2886_v9  ;;  %v2885_v11 = vadd.f32 1.0, %v3215_v48  ;;  %v2951_v48 = vld [vmem:[#allocation3 + $0x38] sm:$0xff] }
 0x41f   :  { %v3217_v37 = vpop.eup %3216  ;;  %v2960_v29 = vld [vmem:[#allocation2] sm:$0xff] }
 0x420   :  { %v3219_v51 = vpop.eup %3218  ;;  %3230 = vrcp.f32 %v2885_v11  ;;  %2970 = vperm.xlu1 %3185, %v2960_v29   ;;  %2931 = vst.msk [vmem:[#allocation2 + $0x30] sm:$0xff] %vm2924_vm0, %v3217_v37  ;;  %v2961_v57 = vld [vmem:[#allocation2 + $0x8] sm:$0xff] }
 0x421   :  { %2928 = vst.msk [vmem:[#allocation2 + $0x18] sm:$0xff] %vm2924_vm0, %v3219_v51  ;;  %2975 = vperm.xlu0 %3184, %v2961_v57   ;;  %v2952_v51 = vld [vmem:[#allocation3 + $0x80] sm:$0xff]  ;;  %v2953_v57 = vld [vmem:[#allocation3 + $0x88] sm:$0xff] }
 0x423   :  { %v3221_v44 = vpop.eup %3220  ;;  %v3062_v25 = vld [vmem:[#allocation2 + $0x20] sm:$0xff] }
 0x424   :  { %v3223_v59 = vpop.eup %3222  ;;  %2933 = vst.msk [vmem:[#allocation2 + $0x40] sm:$0xff] %vm2924_vm0, %v3221_v44  ;;  %v2962_v38 = vld [vmem:[#allocation2 + $0x10] sm:$0xff] }
 0x425   :  { %2930 = vst.msk [vmem:[#allocation2 + $0x28] sm:$0xff] %vm2924_vm0, %v3223_v59  ;;  %2980 = vperm.xlu1 %3185, %v2962_v38  }
 0x427   :  { %v3064_v52 = vld [vmem:[#allocation2 + $0x30] sm:$0xff] }
 0x428   :  { %v2963_v50 = vld [vmem:[#allocation2 + $0x18] sm:$0xff] }
 0x429   :  { %v3225_v18 = vpop.eup %3224  ;;  %2985 = vperm.xlu1 %3185, %v2963_v50   ;;  %v2957_v50 = vld [vmem:[#allocation3 + $0xa8] sm:$0xff] }
 0x42a   :  { %v3227_v7 = vpop.eup %3226  ;;  %v2887_v4 = vadd.f32 1.0, %v3225_v18  ;;  %v2956_v18 = vld [vmem:[#allocation3 + $0xa0] sm:$0xff] }
 0x42b   :  { %v3229_v63 = vpop.eup %3228  ;;  %2932 = vst.msk [vmem:[#allocation2 + $0x38] sm:$0xff] %vm2924_vm0, %v3227_v7  ;;  %v2964_v22 = vld [vmem:[#allocation2 + $0x40] sm:$0xff] }
 0x42c   :  { %3232 = vrcp.f32 %v2887_v4  ;;  %2935 = vst.msk [vmem:[#allocation2 + $0x50] sm:$0xff] %vm2924_vm0, %v3229_v63  ;;  %v3063_v10 = vld [vmem:[#allocation2 + $0x28] sm:$0xff] }
 0x42d   :  { %v3231_v26 = vpop.eup %3230  ;;  %2990 = vperm.xlu1 %3185, %v2964_v22   ;;  %v2954_v22 = vld [vmem:[#allocation3 + $0x90] sm:$0xff] }
 0x42e   :  { %2934 = vst.msk [vmem:[#allocation2 + $0x48] sm:$0xff] %vm2924_vm0, %v3231_v26  ;;  %v2955_v26 = vld [vmem:[#allocation3 + $0x98] sm:$0xff] }
 0x432   :  { %v3065_v14 = vld [vmem:[#allocation2 + $0x38] sm:$0xff] }
 0x433   :  { %v2966_v35 = vld [vmem:[#allocation2 + $0x50] sm:$0xff] }
 0x434   :  { %3000 = vperm.xlu1 %3185, %v2966_v35   ;;  %v3045_v35 = vld [vmem:[#allocation3 + $0x40] sm:$0xff] }
 0x435   :  { %v2965_v46 = vld [vmem:[#allocation2 + $0x48] sm:$0xff] }
 0x436   :  { %2995 = vperm.xlu0 %3184, %v2965_v46   ;;  %v3046_v46 = vld [vmem:[#allocation3 + $0x48] sm:$0xff] }
 0x438   :  { %3072 = vperm.xlu1 %3185, %v3062_v25  }
 0x439   :  { %v3233_v3 = vpop.eup %3232 }
 0x43a   :  { %2936 = vst.msk [vmem:[#allocation2 + $0x58] sm:$0xff] %vm2924_vm0, %v3233_v3 }
 0x43c   :  { %3082 = vperm.xlu1 %3185, %v3064_v52  }
 0x441   :  { %v2967_v40 = vld [vmem:[#allocation2 + $0x58] sm:$0xff] }
 0x442   :  { %3005 = vperm.xlu0 %3184, %v2967_v40  }
 0x446   :  { %3077 = vperm.xlu0 %3184, %v3063_v10  }
 0x44a   :  { %3087 = vperm.xlu0 %3184, %v3065_v14  }
 0x44f   :  { %v2818_v42 = vpop.xlane.xlu1 %2817 }
 0x450   :  { %v3175_v55 = vmul.f32 -1.442695, %v2818_v42  ;;  %v3049_v42 = vld [vmem:[#allocation3 + $0x60] sm:$0xff] }
 0x452   :  { %3234 = vpow2.f32 %v3175_v55  ;;  %v3050_v55 = vld [vmem:[#allocation3 + $0x68] sm:$0xff] }
 0x453   :  { %v2824_v19 = vpop.xlane.xlu1 %2823 }
 0x454   :  { %v3177_v60 = vmul.f32 -1.442695, %v2824_v19 }
 0x455   :  { %v2821_v30 = vpop.xlane.xlu0 %2820 }
 0x456   :  { %v3176_v33 = vmul.f32 -1.442695, %v2821_v30  ;;  %3236 = vpow2.f32 %v3177_v60 }
 0x458   :  { %3238 = vpow2.f32 %v3176_v33  ;;  %v2958_v33 = vld [vmem:[#allocation3 + $0xb0] sm:$0xff] }
 0x459   :  { %v2827_v34 = vpop.xlane.xlu0 %2826 }
 0x45a   :  { %v3178_v43 = vmul.f32 -1.442695, %v2827_v34  ;;  %v2959_v34 = vld [vmem:[#allocation3 + $0xb8] sm:$0xff] }
 0x45c   :  { %3240 = vpow2.f32 %v3178_v43 }
 0x45f   :  { %v3235_v28 = vpop.eup %3234 }
 0x460   :  { %v2888_v12 = vadd.f32 1.0, %v3235_v28 }
 0x462   :  { %3242 = vrcp.f32 %v2888_v12 }
 0x463   :  { %v3237_v27 = vpop.eup %3236 }
 0x464   :  { %v2890_v2 = vadd.f32 1.0, %v3237_v27  ;;  %v3047_v27 = vld [vmem:[#allocation3 + $0x50] sm:$0xff] }
 0x465   :  { %v3239_v17 = vpop.eup %3238 }
 0x466   :  { %v2889_v32 = vadd.f32 1.0, %v3239_v17  ;;  %3244 = vrcp.f32 %v2890_v2  ;;  %v3048_v17 = vld [vmem:[#allocation3 + $0x58] sm:$0xff] }
 0x468   :  { %3246 = vrcp.f32 %v2889_v32 }
 0x469   :  { %v3241_v53 = vpop.eup %3240 }
 0x46a   :  { %v2891_v21 = vadd.f32 1.0, %v3241_v53 }
 0x46c   :  { %3248 = vrcp.f32 %v2891_v21  ;;  %v3051_v21 = vld [vmem:[#allocation3 + $0x70] sm:$0xff] }
 0x46f   :  { %v3243_v6 = vpop.eup %3242 }
 0x470   :  { %2937 = vst.msk [vmem:[#allocation2 + $0x60] sm:$0xff] %vm2924_vm0, %v3243_v6  ;;  %v3052_v6 = vld [vmem:[#allocation3 + $0x78] sm:$0xff] }
 0x473   :  { %v3245_v8 = vpop.eup %3244 }
 0x474   :  { %2939 = vst.msk [vmem:[#allocation2 + $0x70] sm:$0xff] %vm2924_vm0, %v3245_v8 }
 0x475   :  { %v3247_v0 = vpop.eup %3246 }
 0x476   :  { %2938 = vst.msk [vmem:[#allocation2 + $0x68] sm:$0xff] %vm2924_vm0, %v3247_v0 }
 0x477   :  { %v3066_v41 = vld [vmem:[#allocation2 + $0x60] sm:$0xff] }
 0x478   :  { %3092 = vperm.xlu1 %3185, %v3066_v41  }
 0x479   :  { %v3249_v61 = vpop.eup %3248 }
 0x47a   :  { %2940 = vst.msk [vmem:[#allocation2 + $0x78] sm:$0xff] %vm2924_vm0, %v3249_v61  ;;  %v3053_v61 = vld [vmem:[#allocation3 + $0xc0] sm:$0xff] }
 0x47b   :  { %v3068_v45 = vld [vmem:[#allocation2 + $0x70] sm:$0xff] }
 0x47c   :  { %3102 = vperm.xlu1 %3185, %v3068_v45   ;;  %v3054_v45 = vld [vmem:[#allocation3 + $0xc8] sm:$0xff] }
 0x47d   :  { %v3067_v58 = vld [vmem:[#allocation2 + $0x68] sm:$0xff] }
 0x47e   :  { %3097 = vperm.xlu0 %3184, %v3067_v58  }
 0x481   :  { %v3069_v24 = vld [vmem:[#allocation2 + $0x78] sm:$0xff] }
 0x482   :  { %3107 = vperm.xlu0 %3184, %v3069_v24  }
 0x49b   :  { %v2971_v56 = vpop.permute.xlu1 %2970 }
 0x49c   :  { %v3008_v62 = vmul.f32 %v2971_v56, %v2944_v5  ;;  %v3009_v20 = vmul.f32 %v2971_v56, %v2945_v49  ;;  %v2976_v54 = vpop.permute.xlu0 %2975  ;;  %v3057_v49 = vld [vmem:[#allocation3 + $0xe0] sm:$0xff]  ;;  %v3056_v56 = vld [vmem:[#allocation3 + $0xd8] sm:$0xff] }
 0x49d   :  { %v3010_v16 = vmul.f32 %v2976_v54, %v2946_v47  ;;  %v3011_v39 = vmul.f32 %v2976_v54, %v2947_v36  ;;  %v3058_v47 = vld [vmem:[#allocation3 + $0xe8] sm:$0xff]  ;;  %v3055_v36 = vld [vmem:[#allocation3 + $0xd0] sm:$0xff] }
 0x49e   :  { %3026 = vst [vmem:[#allocation6] sm:$0xff] %v3008_v62  ;;  %3027 = vst [vmem:[#allocation6 + $0x8] sm:$0xff] %v3009_v20 }
 0x49f   :  { %3028 = vst [vmem:[#allocation6 + $0x10] sm:$0xff] %v3010_v16  ;;  %3029 = vst [vmem:[#allocation6 + $0x18] sm:$0xff] %v3011_v39 }
 0x4a0   :  { %v2981_v1 = vpop.permute.xlu1 %2980 }
 0x4a1   :  { %v3012_v23 = vmul.f32 %v2981_v1, %v2948_v15  ;;  %v3013_v9 = vmul.f32 %v2981_v1, %v2949_v13  ;;  %v3059_v13 = vld [vmem:[#allocation3 + $0xf0] sm:$0xff]  ;;  %v3060_v1 = vld [vmem:[#allocation3 + $0xf8] sm:$0xff] }
 0x4a3   :  { %3030 = vst [vmem:[#allocation6 + $0x20] sm:$0xff] %v3012_v23  ;;  %3031 = vst [vmem:[#allocation6 + $0x28] sm:$0xff] %v3013_v9 }
 0x4a4   :  { %v2986_v11 = vpop.permute.xlu1 %2985 }
 0x4a5   :  { %v3014_v37 = vmul.f32 %v2986_v11, %v2950_v31  ;;  %v3015_v29 = vmul.f32 %v2986_v11, %v2951_v48 }
 0x4a7   :  { %3032 = vst [vmem:[#allocation6 + $0x30] sm:$0xff] %v3014_v37  ;;  %3033 = vst [vmem:[#allocation6 + $0x38] sm:$0xff] %v3015_v29 }
 0x4a8   :  { %v2991_v44 = vpop.permute.xlu1 %2990 }
 0x4a9   :  { %v3016_v59 = vmul.f32 %v2991_v44, %v2952_v51  ;;  %v3017_v38 = vmul.f32 %v2991_v44, %v2953_v57 }
 0x4ab   :  { %3034 = vst [vmem:[#allocation6 + $0x80] sm:$0xff] %v3016_v59  ;;  %3035 = vst [vmem:[#allocation6 + $0x88] sm:$0xff] %v3017_v38 }
 0x4af   :  { %v3001_v7 = vpop.permute.xlu1 %3000 }
 0x4b0   :  { %v3020_v4 = vmul.f32 %v3001_v7, %v2956_v18  ;;  %v3021_v63 = vmul.f32 %v3001_v7, %v2957_v50 }
 0x4b1   :  { %v2996_v25 = vpop.permute.xlu0 %2995 }
 0x4b2   :  { %3038 = vst [vmem:[#allocation6 + $0xa0] sm:$0xff] %v3020_v4  ;;  %3039 = vst [vmem:[#allocation6 + $0xa8] sm:$0xff] %v3021_v63  ;;  %v3018_v3 = vmul.f32 %v2996_v25, %v2954_v22  ;;  %v3019_v52 = vmul.f32 %v2996_v25, %v2955_v26 }
 0x4b3   :  { %v3073_v40 = vpop.permute.xlu1 %3072 }
 0x4b4   :  { %v3110_v10 = vmul.f32 %v3073_v40, %v3045_v35  ;;  %v3111_v14 = vmul.f32 %v3073_v40, %v3046_v46  ;;  %3036 = vst [vmem:[#allocation6 + $0x90] sm:$0xff] %v3018_v3  ;;  %3037 = vst [vmem:[#allocation6 + $0x98] sm:$0xff] %v3019_v52 }
 0x4b6   :  { %3128 = vst [vmem:[#allocation6 + $0x40] sm:$0xff] %v3110_v10  ;;  %3129 = vst [vmem:[#allocation6 + $0x48] sm:$0xff] %v3111_v14 }
 0x4b7   :  { %v3083_v19 = vpop.permute.xlu1 %3082 }
 0x4b8   :  { %v3114_v60 = vmul.f32 %v3083_v19, %v3049_v42  ;;  %v3115_v30 = vmul.f32 %v3083_v19, %v3050_v55 }
 0x4ba   :  { %3132 = vst [vmem:[#allocation6 + $0x60] sm:$0xff] %v3114_v60  ;;  %3133 = vst [vmem:[#allocation6 + $0x68] sm:$0xff] %v3115_v30 }
 0x4bd   :  { %v3006_v43 = vpop.permute.xlu0 %3005 }
 0x4be   :  { %v3022_v28 = vmul.f32 %v3006_v43, %v2958_v33  ;;  %v3023_v12 = vmul.f32 %v3006_v43, %v2959_v34 }
 0x4c0   :  { %3040 = vst [vmem:[#allocation6 + $0xb0] sm:$0xff] %v3022_v28  ;;  %3041 = vst [vmem:[#allocation6 + $0xb8] sm:$0xff] %v3023_v12 }
 0x4c1   :  { %v3078_v2 = vpop.permute.xlu0 %3077 }
 0x4c2   :  { %v3112_v32 = vmul.f32 %v3078_v2, %v3047_v27  ;;  %v3113_v53 = vmul.f32 %v3078_v2, %v3048_v17 }
 0x4c4   :  { %3130 = vst [vmem:[#allocation6 + $0x50] sm:$0xff] %v3112_v32  ;;  %3131 = vst [vmem:[#allocation6 + $0x58] sm:$0xff] %v3113_v53 }
 0x4c5   :  { %v3088_v8 = vpop.permute.xlu0 %3087 }
 0x4c6   :  { %v3116_v0 = vmul.f32 %v3088_v8, %v3051_v21  ;;  %v3117_v41 = vmul.f32 %v3088_v8, %v3052_v6 }
 0x4c8   :  { %3134 = vst [vmem:[#allocation6 + $0x70] sm:$0xff] %v3116_v0  ;;  %3135 = vst [vmem:[#allocation6 + $0x78] sm:$0xff] %v3117_v41 }
 0x4f3   :  { %v3093_v58 = vpop.permute.xlu1 %3092 }
 0x4f4   :  { %v3118_v24 = vmul.f32 %v3093_v58, %v3053_v61  ;;  %v3119_v5 = vmul.f32 %v3093_v58, %v3054_v45 }
 0x4f6   :  { %3136 = vst [vmem:[#allocation6 + $0xc0] sm:$0xff] %v3118_v24  ;;  %3137 = vst [vmem:[#allocation6 + $0xc8] sm:$0xff] %v3119_v5 }
 0x4f7   :  { %v3103_v62 = vpop.permute.xlu1 %3102 }
 0x4f8   :  { %v3122_v20 = vmul.f32 %v3103_v62, %v3057_v49  ;;  %v3123_v54 = vmul.f32 %v3103_v62, %v3058_v47 }
 0x4f9   :  { %v3098_v16 = vpop.permute.xlu0 %3097 }
 0x4fa   :  { %v3120_v39 = vmul.f32 %v3098_v16, %v3055_v36  ;;  %v3121_v15 = vmul.f32 %v3098_v16, %v3056_v56  ;;  %3140 = vst [vmem:[#allocation6 + $0xe0] sm:$0xff] %v3122_v20  ;;  %3141 = vst [vmem:[#allocation6 + $0xe8] sm:$0xff] %v3123_v54 }
 0x4fc   :  { %3138 = vst [vmem:[#allocation6 + $0xd0] sm:$0xff] %v3120_v39  ;;  %3139 = vst [vmem:[#allocation6 + $0xd8] sm:$0xff] %v3121_v15 }
 0x4fd   :  { %v3108_v23 = vpop.permute.xlu0 %3107 }
 0x4fe   :  { %v3124_v9 = vmul.f32 %v3108_v23, %v3059_v13  ;;  %v3125_v31 = vmul.f32 %v3108_v23, %v3060_v1 }
 0x500   :  { %3142 = vst [vmem:[#allocation6 + $0xf0] sm:$0xff] %v3124_v9  ;;  %3143 = vst [vmem:[#allocation6 + $0xf8] sm:$0xff] %v3125_v31 }
 0x501   :  { %3281 = shalt.err (!%p3278_p9)
}
 0x502   :  { %3155 = dma.vmem_to_hbm [thread:$0]  %s3150_s8, 4096, %s4897_s3, [#allocation5], %s3295_s15, %s3295_s15, %s3296_s16  }
 0x503   :  { %3292 = dma.done.wait [#allocation5], 4096  }
 0x504   :  { %3293 = vsyncadd [#allocation5], 4294963200 }
 0x505   :  { %3159 = vsyncpa [#allocation4], 1 }
 0x506   :  { %3160 = vsyncpa [#allocation5], 1 }

</bundles_post_ra>
